<compile_context>
chip_gen: v5e
topology: v5e:2x2
jax: 0.10.0
libtpu: 0.0.40
codegen_flags: <defaults>
</compile_context>

<pallas_src>
import jax
import jax.numpy as jnp
import numpy as np
from jax import lax
from jax.experimental import pallas as pl
from jax.experimental.pallas import tpu as pltpu

LANE = 128


def _round_up(x, m):
    return (x + m - 1) // m * m


def _pick_band_rows(h):
    # Largest band height <= 16 that divides H (whole image if H is small).
    if h <= 16:
        return h
    for th in range(16, 1, -1):
        if h % th == 0:
            return th
    return h


def bottleneck_kernel(x_ref, w1_ref, s1_ref, b1_ref,
                      w2_ref, s2_ref, b2_ref,
                      w3_ref, s3_ref, b3_ref,
                      out_ref):
    f32, bf16 = jnp.float32, jnp.bfloat16
    Nb, H, W, Cin = x_ref.shape        # Cin padded to a multiple of 128 (f32)
    Wd = w1_ref.shape[1]               # width padded to a multiple of 128
    Cout = w3_ref.shape[1]             # Cout  padded to a multiple of 128
    TH = out_ref.shape[1]              # output rows per band
    Mb = Nb * TH * W                   # matmul M for conv2 / conv3 / output
    Me = Nb * (TH + 2) * W             # matmul M for conv1 (band + 1-row halo)

    j = pl.program_id(1)
    n_bands = pl.num_programs(1)
    row0 = pl.multiple_of(j * TH, TH)

    # ---- gather band rows + 1-row halo (x stays f32; no extra HBM pass) ----
    x_band = x_ref[:, pl.ds(row0, TH), :, :]                 # (Nb,TH,W,Cin)
    top_idx = jnp.maximum(row0 - 1, 0)                       # clamped (masked later)
    bot_idx = jnp.minimum(row0 + TH, H - 1)
    x_top = x_ref[:, pl.ds(top_idx, 1), :, :]
    x_bot = x_ref[:, pl.ds(bot_idx, 1), :, :]
    x_ext = jnp.concatenate([x_top, x_band, x_bot], axis=1)  # (Nb,TH+2,W,Cin) f32

    # ---- conv1 (1x1) + bn1 + relu on band+halo rows (bf16 MXU, f32 acc) ----
    h1 = jnp.dot(x_ext.reshape(Me, Cin).astype(bf16), w1_ref[...],
                 preferred_element_type=f32)
    h1 = jnp.maximum(h1 * s1_ref[...] + b1_ref[...], 0.0)    # (Me, Wd) f32
    h1 = h1.reshape(Nb, TH + 2, W, Wd)

    # Halo rows outside the image must be zero (conv2's zero padding); rows at
    # band-interior boundaries are real neighbor rows and are kept.
    top_ok = jnp.where(j > 0, 1.0, 0.0)
    bot_ok = jnp.where(j < n_bands - 1, 1.0, 0.0)
    h1_top = (h1[:, 0:1] * top_ok).astype(bf16)               # (Nb,1,W,Wd)
    h1_mid = h1[:, 1:TH + 1].astype(bf16)                     # (Nb,TH,W,Wd)
    h1_bot = (h1[:, TH + 1:TH + 2] * bot_ok).astype(bf16)     # (Nb,1,W,Wd)

    # Row-shifted bases (dy = -1, 0, +1), built in bf16.
    ay = (jnp.concatenate([h1_top, h1_mid[:, :TH - 1]], axis=1),
          h1_mid,
          jnp.concatenate([h1_mid[:, 1:], h1_bot], axis=1))

    # ---- conv2 (3x3, pad=1) as 9 accumulating bf16 dots, f32 accumulator ----
    zcol = jnp.zeros((Nb, TH, 1, Wd), bf16)
    h2 = jnp.zeros((Mb, Wd), f32)
    for ky in range(3):
        a = ay[ky]
        for kx in range(3):
            if kx == 0:      # tap[..., x, :] = a[..., x-1, :]
                tap = jnp.concatenate([zcol, a[:, :, :W - 1]], axis=2)
            elif kx == 2:    # tap[..., x, :] = a[..., x+1, :]
                tap = jnp.concatenate([a[:, :, 1:], zcol], axis=2)
            else:
                tap = a
            t = ky * 3 + kx
            h2 = h2 + jnp.dot(tap.reshape(Mb, Wd),
                              w2_ref[t * Wd:(t + 1) * Wd, :],
                              preferred_element_type=f32)
    h2 = jnp.maximum(h2 * s2_ref[...] + b2_ref[...], 0.0)     # (Mb, Wd) f32

    # ---- conv3 (1x1) + bn3, full-precision identity residual, final relu ----
    h3 = jnp.dot(h2.astype(bf16), w3_ref[...], preferred_element_type=f32)
    h3 = h3 * s3_ref[...] + b3_ref[...]                        # (Mb, Cout) f32
    out = jnp.maximum(h3 + x_band.reshape(Mb, Cin), 0.0)       # f32 residual
    out_ref[...] = out.reshape(Nb, TH, W, Cout).astype(out_ref.dtype)


def bottleneck_pallas(x_nhwc, w1, s1, b1, w2, s2, b2, w3, s3, b3,
                      *, block_n=2, band_rows=None, out_dtype=jnp.float32,
                      vmem_limit_bytes=64 * 1024 * 1024):
    N, H, W, Cin = x_nhwc.shape
    width = w1.shape[1]
    Cout = w3.shape[1]
    assert Cin == Cout, "identity residual requires inplanes == planes * expansion"
    assert W % 8 == 0, "W must be a multiple of 8 for layout-preserving reshapes"
    assert H >= 2
    TH = band_rows if band_rows is not None else _pick_band_rows(H)
    assert 2 <= TH <= H and H % TH == 0, "band_rows must divide H and be >= 2"

    f32, bf16 = jnp.float32, jnp.bfloat16
    Cin_p = _round_up(Cin, LANE)
    Wd_p = _round_up(width, LANE)
    Cout_p = _round_up(Cout, LANE)
    Np = _round_up(N, block_n)

    # x stays f32 (single HBM read inside the kernel; full-precision residual).
    xp = x_nhwc.astype(f32)
    if (Np != N) or (Cin_p != Cin):
        xp = jnp.pad(xp, ((0, Np - N), (0, 0), (0, 0), (0, Cin_p - Cin)))

    # Weights: lane-dense padding, bf16 for the MXU; w2 flattened once here.
    w1p = jnp.pad(w1, ((0, Cin_p - Cin), (0, Wd_p - width))).astype(bf16)
    w2p = jnp.pad(w2, ((0, 0), (0, 0),
                       (0, Wd_p - width), (0, Wd_p - width)))
    w2p = w2p.reshape(9 * Wd_p, Wd_p).astype(bf16)
    w3p = jnp.pad(w3, ((0, Wd_p - width), (0, Cout_p - Cout))).astype(bf16)

    pad_vec = lambda v, c: jnp.pad(v.astype(f32).reshape(1, -1),
                                   ((0, 0), (0, c - v.size)))
    s1p, b1p = pad_vec(s1, Wd_p), pad_vec(b1, Wd_p)
    s2p, b2p = pad_vec(s2, Wd_p), pad_vec(b2, Wd_p)
    s3p, b3p = pad_vec(s3, Cout_p), pad_vec(b3, Cout_p)

    full = lambda *shape: pl.BlockSpec(shape, lambda n, j: (0,) * len(shape))

    out = pl.pallas_call(
        bottleneck_kernel,
        out_shape=jax.ShapeDtypeStruct((Np, H, W, Cout_p), out_dtype),
        grid_spec=pltpu.PrefetchScalarGridSpec(
            num_scalar_prefetch=0,
            grid=(Np // block_n, H // TH),
            in_specs=[
                # x block is constant across the inner band axis -> stays VMEM-resident.
                pl.BlockSpec((block_n, H, W, Cin_p), lambda n, j: (n, 0, 0, 0)),
                full(Cin_p, Wd_p),               # w1  (bf16)
                full(1, Wd_p),                   # bn1 scale (f32)
                full(1, Wd_p),                   # bn1 bias
                full(9 * Wd_p, Wd_p),            # w2 flattened (bf16)
                full(1, Wd_p),                   # bn2 scale
                full(1, Wd_p),                   # bn2 bias
                full(Wd_p, Cout_p),              # w3  (bf16)
                full(1, Cout_p),                 # bn3 scale
                full(1, Cout_p),                 # bn3 bias
            ],
            out_specs=pl.BlockSpec((block_n, TH, W, Cout_p),
                                   lambda n, j: (n, j, 0, 0)),
        ),
        compiler_params=pltpu.CompilerParams(
            dimension_semantics=("parallel", "parallel"),
            vmem_limit_bytes=vmem_limit_bytes,
        ),
    )(xp, w1p, s1p, b1p, w2p, s2p, b2p, w3p, s3p, b3p)

    return out[:N, :, :, :Cout]


# ---------------- pure-JAX reference (for validation only) ----------------
# Matches the kernel's precision contract: conv operands in bf16 (MXU path),
# accumulation / BN / ReLU in f32, identity residual in full f32.
def _conv_nhwc(x, w_hwio, padding):
    return lax.conv_general_dilated(
        x, w_hwio, window_strides=(1, 1), padding=padding,
        dimension_numbers=("NHWC", "HWIO", "NHWC"),
        preferred_element_type=jnp.float32)


def bottleneck_ref(x_nhwc, w1, s1, b1, w2, s2, b2, w3, s3, b3):
    bf16 = jnp.bfloat16
    Cin, width = w1.shape
    Cout = w3.shape[1]
    h = _conv_nhwc(x_nhwc.astype(bf16),
                   w1.reshape(1, 1, Cin, width).astype(bf16), "VALID")
    h = jnp.maximum(h * s1 + b1, 0.0)
    h = _conv_nhwc(h.astype(bf16), w2.astype(bf16), ((1, 1), (1, 1)))
    h = jnp.maximum(h * s2 + b2, 0.0)
    h = _conv_nhwc(h.astype(bf16), w3.reshape(1, 1, width, Cout).astype(bf16),
                   "VALID")
    h = h * s3 + b3
    return jnp.maximum(h + x_nhwc.astype(jnp.float32), 0.0)


def fold_bn(gamma, beta, mean, var, eps=1e-5):
    scale = gamma / jnp.sqrt(var + eps)
    bias = beta - mean * scale
    return scale.reshape(1, -1), bias.reshape(1, -1)


if __name__ == "__main__":
    # Bottleneck(inplanes=16, planes=4): width=4, expansion*planes=16.
    N, H, W = 4, 8, 8
    inplanes, planes = 16, 4
    width = planes          # base_width=64, groups=1
    cout = planes * 4       # expansion = 4

    key = jax.random.PRNGKey(0)
    ks = jax.random.split(key, 8)

    x_nhwc = jax.random.normal(ks[0], (N, H, W, inplanes), jnp.float32)

    # Conv weights (1x1 convs stored as (Cin, Cout) matmuls, 3x3 conv HWIO).
    w1 = jax.random.normal(ks[1], (inplanes, width), jnp.float32) * 0.3
    w2 = jax.random.normal(ks[2], (3, 3, width, width), jnp.float32) * 0.2
    w3 = jax.random.normal(ks[3], (width, cout), jnp.float32) * 0.3

    # Deterministic BatchNorm (eval mode) parameters, folded to scale/bias.
    def bn_params(k, c):
        k1, k2, k3 = jax.random.split(k, 3)
        gamma = 1.0 + 0.1 * jax.random.normal(k1, (c,), jnp.float32)
        beta = 0.1 * jax.random.normal(k2, (c,), jnp.float32)
        mean = 0.05 * jax.random.normal(k3, (c,), jnp.float32)
        var = 1.0 + 0.1 * jnp.abs(jax.random.normal(k1, (c,), jnp.float32))
        return fold_bn(gamma, beta, mean, var)

    s1, b1 = bn_params(ks[4], width)
    s2, b2 = bn_params(ks[5], width)
    s3, b3 = bn_params(ks[6], cout)

    ref = bottleneck_ref(x_nhwc, w1, s1, b1, w2, s2, b2, w3, s3, b3)

    # Multi-band path (2 bands of 4 rows) -> exercises the halo / edge-mask logic.
    out_bands = bottleneck_pallas(x_nhwc, w1, s1, b1, w2, s2, b2, w3, s3, b3,
                                  block_n=2, band_rows=4)
    out_bands = jax.block_until_ready(out_bands)
    np.testing.assert_allclose(np.asarray(out_bands), np.asarray(ref),
                               rtol=2e-3, atol=2e-3)

    # Single-band path (whole image per grid step).
    out_full = bottleneck_pallas(x_nhwc, w1, s1, b1, w2, s2, b2, w3, s3, b3,
                                 block_n=2, band_rows=8)
    out_full = jax.block_until_ready(out_full)
    np.testing.assert_allclose(np.asarray(out_full), np.asarray(ref),
                               rtol=2e-3, atol=2e-3)

    print("KERNEL_OK")
</pallas_src>

<mosaic_0001>
module attributes {stable_mosaic.version = 11 : i64} {
  func.func @bottleneck_kernel(%arg0: i32, %arg1: i32, %arg2: memref<2x8x8x128xf32, #tpu.memory_space<vmem>>, %arg3: memref<128x128xbf16, #tpu.memory_space<vmem>>, %arg4: memref<1x128xf32, #tpu.memory_space<vmem>>, %arg5: memref<1x128xf32, #tpu.memory_space<vmem>>, %arg6: memref<1152x128xbf16, #tpu.memory_space<vmem>>, %arg7: memref<1x128xf32, #tpu.memory_space<vmem>>, %arg8: memref<1x128xf32, #tpu.memory_space<vmem>>, %arg9: memref<128x128xbf16, #tpu.memory_space<vmem>>, %arg10: memref<1x128xf32, #tpu.memory_space<vmem>>, %arg11: memref<1x128xf32, #tpu.memory_space<vmem>>, %arg12: memref<2x4x8x128xf32, #tpu.memory_space<vmem>>) attributes {dimension_semantics = [#tpu.dimension_semantics<parallel>, #tpu.dimension_semantics<parallel>], iteration_bounds = array<i64: 2, 2>, scalar_prefetch = 0 : i64, scratch_operands = 0 : i64, tpu.core_type = #tpu.core_type<tc>, window_params = [{transform_indices = @transform_0, window_bounds = array<i64: 2, 8, 8, 128>}, {pipeline_mode = #tpu.pipeline_mode<synchronous>, transform_indices = @transform_1, window_bounds = array<i64: 128, 128>}, {pipeline_mode = #tpu.pipeline_mode<synchronous>, transform_indices = @transform_2, window_bounds = array<i64: 1, 128>}, {pipeline_mode = #tpu.pipeline_mode<synchronous>, transform_indices = @transform_3, window_bounds = array<i64: 1, 128>}, {pipeline_mode = #tpu.pipeline_mode<synchronous>, transform_indices = @transform_4, window_bounds = array<i64: 1152, 128>}, {pipeline_mode = #tpu.pipeline_mode<synchronous>, transform_indices = @transform_5, window_bounds = array<i64: 1, 128>}, {pipeline_mode = #tpu.pipeline_mode<synchronous>, transform_indices = @transform_6, window_bounds = array<i64: 1, 128>}, {pipeline_mode = #tpu.pipeline_mode<synchronous>, transform_indices = @transform_7, window_bounds = array<i64: 128, 128>}, {pipeline_mode = #tpu.pipeline_mode<synchronous>, transform_indices = @transform_8, window_bounds = array<i64: 1, 128>}, {pipeline_mode = #tpu.pipeline_mode<synchronous>, transform_indices = @transform_9, window_bounds = array<i64: 1, 128>}, {transform_indices = @transform_10, window_bounds = array<i64: 2, 4, 8, 128>}]} {
    %c4_i32 = arith.constant 4 : i32
    %0 = arith.muli %arg1, %c4_i32 : i32
    %1 = tpu.assume_multiple %0, 4 : i32
    %c0 = arith.constant 0 : index
    %2 = arith.index_cast %1 : i32 to index
    %c0_0 = arith.constant 0 : index
    %c0_1 = arith.constant 0 : index
    %3 = vector.load %arg2[%c0, %2, %c0_0, %c0_1] : memref<2x8x8x128xf32, #tpu.memory_space<vmem>>, vector<2x4x8x128xf32>
    %c1_i32 = arith.constant 1 : i32
    %4 = arith.subi %1, %c1_i32 : i32
    %c0_i32 = arith.constant 0 : i32
    %5 = arith.maxsi %4, %c0_i32 : i32
    %c4_i32_2 = arith.constant 4 : i32
    %6 = arith.addi %1, %c4_i32_2 : i32
    %c7_i32 = arith.constant 7 : i32
    %7 = arith.minsi %6, %c7_i32 : i32
    %c0_3 = arith.constant 0 : index
    %8 = arith.index_cast %5 : i32 to index
    %c0_4 = arith.constant 0 : index
    %c0_5 = arith.constant 0 : index
    %9 = vector.load %arg2[%c0_3, %8, %c0_4, %c0_5] : memref<2x8x8x128xf32, #tpu.memory_space<vmem>>, vector<2x1x8x128xf32>
    %c0_6 = arith.constant 0 : index
    %10 = arith.index_cast %7 : i32 to index
    %c0_7 = arith.constant 0 : index
    %c0_8 = arith.constant 0 : index
    %11 = vector.load %arg2[%c0_6, %10, %c0_7, %c0_8] : memref<2x8x8x128xf32, #tpu.memory_space<vmem>>, vector<2x1x8x128xf32>
    %12 = tpu.concatenate %9, %3, %11 in 1 : vector<2x1x8x128xf32>, vector<2x4x8x128xf32>, vector<2x1x8x128xf32> -> vector<2x6x8x128xf32>
    %13 = vector.shape_cast %12 : vector<2x6x8x128xf32> to vector<96x128xf32>
    %14 = arith.truncf %13 : vector<96x128xf32> to vector<96x128xbf16>
    %c0_9 = arith.constant 0 : index
    %c0_10 = arith.constant 0 : index
    %15 = vector.load %arg3[%c0_9, %c0_10] : memref<128x128xbf16, #tpu.memory_space<vmem>>, vector<128x128xbf16>
    %cst = arith.constant dense<0.000000e+00> : vector<96x128xf32>
    %16 = tpu.matmul %14, %15, %cst {dimension_numbers = #tpu.dot_dimension_numbers<[1], [0], [0], [1], [0, 0, 1, 1], [], []>} : vector<96x128xbf16>, vector<128x128xbf16>, vector<96x128xf32> -> vector<96x128xf32>
    %c0_11 = arith.constant 0 : index
    %c0_12 = arith.constant 0 : index
    %17 = vector.load %arg4[%c0_11, %c0_12] : memref<1x128xf32, #tpu.memory_space<vmem>>, vector<1x128xf32>
    %18 = vector.broadcast %17 : vector<1x128xf32> to vector<96x128xf32>
    %19 = arith.mulf %16, %18 : vector<96x128xf32>
    %c0_13 = arith.constant 0 : index
    %c0_14 = arith.constant 0 : index
    %20 = vector.load %arg5[%c0_13, %c0_14] : memref<1x128xf32, #tpu.memory_space<vmem>>, vector<1x128xf32>
    %21 = vector.broadcast %20 : vector<1x128xf32> to vector<96x128xf32>
    %22 = arith.addf %19, %21 : vector<96x128xf32>
    %cst_15 = arith.constant 0.000000e+00 : f32
    %23 = vector.broadcast %cst_15 : f32 to vector<96x128xf32>
    %24 = arith.maximumf %22, %23 : vector<96x128xf32>
    %25 = vector.shape_cast %24 : vector<96x128xf32> to vector<2x6x8x128xf32>
    %c0_i32_16 = arith.constant 0 : i32
    %26 = arith.cmpi sgt, %arg1, %c0_i32_16 : i32
    %cst_17 = arith.constant 1.000000e+00 : f32
    %cst_18 = arith.constant 0.000000e+00 : f32
    %27 = arith.select %26, %cst_17, %cst_18 : f32
    %c1_i32_19 = arith.constant 1 : i32
    %28 = arith.cmpi slt, %arg1, %c1_i32_19 : i32
    %cst_20 = arith.constant 1.000000e+00 : f32
    %cst_21 = arith.constant 0.000000e+00 : f32
    %29 = arith.select %28, %cst_20, %cst_21 : f32
    %30 = vector.extract_strided_slice %25 {offsets = [0, 0, 0, 0], sizes = [2, 1, 8, 128], strides = [1, 1, 1, 1]} : vector<2x6x8x128xf32> to vector<2x1x8x128xf32>
    %31 = vector.broadcast %27 : f32 to vector<2x1x8x128xf32>
    %32 = arith.mulf %30, %31 : vector<2x1x8x128xf32>
    %33 = arith.truncf %32 : vector<2x1x8x128xf32> to vector<2x1x8x128xbf16>
    %34 = vector.extract_strided_slice %25 {offsets = [0, 1, 0, 0], sizes = [2, 4, 8, 128], strides = [1, 1, 1, 1]} : vector<2x6x8x128xf32> to vector<2x4x8x128xf32>
    %35 = arith.truncf %34 : vector<2x4x8x128xf32> to vector<2x4x8x128xbf16>
    %36 = vector.extract_strided_slice %25 {offsets = [0, 5, 0, 0], sizes = [2, 1, 8, 128], strides = [1, 1, 1, 1]} : vector<2x6x8x128xf32> to vector<2x1x8x128xf32>
    %37 = vector.broadcast %29 : f32 to vector<2x1x8x128xf32>
    %38 = arith.mulf %36, %37 : vector<2x1x8x128xf32>
    %39 = arith.truncf %38 : vector<2x1x8x128xf32> to vector<2x1x8x128xbf16>
    %40 = vector.extract_strided_slice %35 {offsets = [0, 0, 0, 0], sizes = [2, 3, 8, 128], strides = [1, 1, 1, 1]} : vector<2x4x8x128xbf16> to vector<2x3x8x128xbf16>
    %41 = tpu.concatenate %33, %40 in 1 : vector<2x1x8x128xbf16>, vector<2x3x8x128xbf16> -> vector<2x4x8x128xbf16>
    %42 = vector.extract_strided_slice %35 {offsets = [0, 1, 0, 0], sizes = [2, 3, 8, 128], strides = [1, 1, 1, 1]} : vector<2x4x8x128xbf16> to vector<2x3x8x128xbf16>
    %43 = tpu.concatenate %42, %39 in 1 : vector<2x3x8x128xbf16>, vector<2x1x8x128xbf16> -> vector<2x4x8x128xbf16>
    %cst_22 = arith.constant 0.000000e+00 : bf16
    %44 = vector.broadcast %cst_22 : bf16 to vector<2x4x1x128xbf16>
    %cst_23 = arith.constant 0.000000e+00 : f32
    %45 = vector.broadcast %cst_23 : f32 to vector<64x128xf32>
    %46 = vector.extract_strided_slice %41 {offsets = [0, 0, 0, 0], sizes = [2, 4, 7, 128], strides = [1, 1, 1, 1]} : vector<2x4x8x128xbf16> to vector<2x4x7x128xbf16>
    %47 = tpu.concatenate %44, %46 in 2 : vector<2x4x1x128xbf16>, vector<2x4x7x128xbf16> -> vector<2x4x8x128xbf16>
    %48 = vector.shape_cast %47 : vector<2x4x8x128xbf16> to vector<64x128xbf16>
    %c0_24 = arith.constant 0 : index
    %c0_25 = arith.constant 0 : index
    %49 = vector.load %arg6[%c0_24, %c0_25] : memref<1152x128xbf16, #tpu.memory_space<vmem>>, vector<128x128xbf16>
    %cst_26 = arith.constant dense<0.000000e+00> : vector<64x128xf32>
    %50 = tpu.matmul %48, %49, %cst_26 {dimension_numbers = #tpu.dot_dimension_numbers<[1], [0], [0], [1], [0, 0, 1, 1], [], []>} : vector<64x128xbf16>, vector<128x128xbf16>, vector<64x128xf32> -> vector<64x128xf32>
    %51 = arith.addf %45, %50 : vector<64x128xf32>
    %52 = vector.shape_cast %41 : vector<2x4x8x128xbf16> to vector<64x128xbf16>
    %c128 = arith.constant 128 : index
    %c0_27 = arith.constant 0 : index
    %53 = vector.load %arg6[%c128, %c0_27] : memref<1152x128xbf16, #tpu.memory_space<vmem>>, vector<128x128xbf16>
    %cst_28 = arith.constant dense<0.000000e+00> : vector<64x128xf32>
    %54 = tpu.matmul %52, %53, %cst_28 {dimension_numbers = #tpu.dot_dimension_numbers<[1], [0], [0], [1], [0, 0, 1, 1], [], []>} : vector<64x128xbf16>, vector<128x128xbf16>, vector<64x128xf32> -> vector<64x128xf32>
    %55 = arith.addf %51, %54 : vector<64x128xf32>
    %56 = vector.extract_strided_slice %41 {offsets = [0, 0, 1, 0], sizes = [2, 4, 7, 128], strides = [1, 1, 1, 1]} : vector<2x4x8x128xbf16> to vector<2x4x7x128xbf16>
    %57 = tpu.concatenate %56, %44 in 2 : vector<2x4x7x128xbf16>, vector<2x4x1x128xbf16> -> vector<2x4x8x128xbf16>
    %58 = vector.shape_cast %57 : vector<2x4x8x128xbf16> to vector<64x128xbf16>
    %c256 = arith.constant 256 : index
    %c0_29 = arith.constant 0 : index
    %59 = vector.load %arg6[%c256, %c0_29] : memref<1152x128xbf16, #tpu.memory_space<vmem>>, vector<128x128xbf16>
    %cst_30 = arith.constant dense<0.000000e+00> : vector<64x128xf32>
    %60 = tpu.matmul %58, %59, %cst_30 {dimension_numbers = #tpu.dot_dimension_numbers<[1], [0], [0], [1], [0, 0, 1, 1], [], []>} : vector<64x128xbf16>, vector<128x128xbf16>, vector<64x128xf32> -> vector<64x128xf32>
    %61 = arith.addf %55, %60 : vector<64x128xf32>
    %62 = vector.extract_strided_slice %35 {offsets = [0, 0, 0, 0], sizes = [2, 4, 7, 128], strides = [1, 1, 1, 1]} : vector<2x4x8x128xbf16> to vector<2x4x7x128xbf16>
    %63 = tpu.concatenate %44, %62 in 2 : vector<2x4x1x128xbf16>, vector<2x4x7x128xbf16> -> vector<2x4x8x128xbf16>
    %64 = vector.shape_cast %63 : vector<2x4x8x128xbf16> to vector<64x128xbf16>
    %c384 = arith.constant 384 : index
    %c0_31 = arith.constant 0 : index
    %65 = vector.load %arg6[%c384, %c0_31] : memref<1152x128xbf16, #tpu.memory_space<vmem>>, vector<128x128xbf16>
    %cst_32 = arith.constant dense<0.000000e+00> : vector<64x128xf32>
    %66 = tpu.matmul %64, %65, %cst_32 {dimension_numbers = #tpu.dot_dimension_numbers<[1], [0], [0], [1], [0, 0, 1, 1], [], []>} : vector<64x128xbf16>, vector<128x128xbf16>, vector<64x128xf32> -> vector<64x128xf32>
    %67 = arith.addf %61, %66 : vector<64x128xf32>
    %68 = vector.shape_cast %35 : vector<2x4x8x128xbf16> to vector<64x128xbf16>
    %c512 = arith.constant 512 : index
    %c0_33 = arith.constant 0 : index
    %69 = vector.load %arg6[%c512, %c0_33] : memref<1152x128xbf16, #tpu.memory_space<vmem>>, vector<128x128xbf16>
    %cst_34 = arith.constant dense<0.000000e+00> : vector<64x128xf32>
    %70 = tpu.matmul %68, %69, %cst_34 {dimension_numbers = #tpu.dot_dimension_numbers<[1], [0], [0], [1], [0, 0, 1, 1], [], []>} : vector<64x128xbf16>, vector<128x128xbf16>, vector<64x128xf32> -> vector<64x128xf32>
    %71 = arith.addf %67, %70 : vector<64x128xf32>
    %72 = vector.extract_strided_slice %35 {offsets = [0, 0, 1, 0], sizes = [2, 4, 7, 128], strides = [1, 1, 1, 1]} : vector<2x4x8x128xbf16> to vector<2x4x7x128xbf16>
    %73 = tpu.concatenate %72, %44 in 2 : vector<2x4x7x128xbf16>, vector<2x4x1x128xbf16> -> vector<2x4x8x128xbf16>
    %74 = vector.shape_cast %73 : vector<2x4x8x128xbf16> to vector<64x128xbf16>
    %c640 = arith.constant 640 : index
    %c0_35 = arith.constant 0 : index
    %75 = vector.load %arg6[%c640, %c0_35] : memref<1152x128xbf16, #tpu.memory_space<vmem>>, vector<128x128xbf16>
    %cst_36 = arith.constant dense<0.000000e+00> : vector<64x128xf32>
    %76 = tpu.matmul %74, %75, %cst_36 {dimension_numbers = #tpu.dot_dimension_numbers<[1], [0], [0], [1], [0, 0, 1, 1], [], []>} : vector<64x128xbf16>, vector<128x128xbf16>, vector<64x128xf32> -> vector<64x128xf32>
    %77 = arith.addf %71, %76 : vector<64x128xf32>
    %78 = vector.extract_strided_slice %43 {offsets = [0, 0, 0, 0], sizes = [2, 4, 7, 128], strides = [1, 1, 1, 1]} : vector<2x4x8x128xbf16> to vector<2x4x7x128xbf16>
    %79 = tpu.concatenate %44, %78 in 2 : vector<2x4x1x128xbf16>, vector<2x4x7x128xbf16> -> vector<2x4x8x128xbf16>
    %80 = vector.shape_cast %79 : vector<2x4x8x128xbf16> to vector<64x128xbf16>
    %c768 = arith.constant 768 : index
    %c0_37 = arith.constant 0 : index
    %81 = vector.load %arg6[%c768, %c0_37] : memref<1152x128xbf16, #tpu.memory_space<vmem>>, vector<128x128xbf16>
    %cst_38 = arith.constant dense<0.000000e+00> : vector<64x128xf32>
    %82 = tpu.matmul %80, %81, %cst_38 {dimension_numbers = #tpu.dot_dimension_numbers<[1], [0], [0], [1], [0, 0, 1, 1], [], []>} : vector<64x128xbf16>, vector<128x128xbf16>, vector<64x128xf32> -> vector<64x128xf32>
    %83 = arith.addf %77, %82 : vector<64x128xf32>
    %84 = vector.shape_cast %43 : vector<2x4x8x128xbf16> to vector<64x128xbf16>
    %c896 = arith.constant 896 : index
    %c0_39 = arith.constant 0 : index
    %85 = vector.load %arg6[%c896, %c0_39] : memref<1152x128xbf16, #tpu.memory_space<vmem>>, vector<128x128xbf16>
    %cst_40 = arith.constant dense<0.000000e+00> : vector<64x128xf32>
    %86 = tpu.matmul %84, %85, %cst_40 {dimension_numbers = #tpu.dot_dimension_numbers<[1], [0], [0], [1], [0, 0, 1, 1], [], []>} : vector<64x128xbf16>, vector<128x128xbf16>, vector<64x128xf32> -> vector<64x128xf32>
    %87 = arith.addf %83, %86 : vector<64x128xf32>
    %88 = vector.extract_strided_slice %43 {offsets = [0, 0, 1, 0], sizes = [2, 4, 7, 128], strides = [1, 1, 1, 1]} : vector<2x4x8x128xbf16> to vector<2x4x7x128xbf16>
    %89 = tpu.concatenate %88, %44 in 2 : vector<2x4x7x128xbf16>, vector<2x4x1x128xbf16> -> vector<2x4x8x128xbf16>
    %90 = vector.shape_cast %89 : vector<2x4x8x128xbf16> to vector<64x128xbf16>
    %c1024 = arith.constant 1024 : index
    %c0_41 = arith.constant 0 : index
    %91 = vector.load %arg6[%c1024, %c0_41] : memref<1152x128xbf16, #tpu.memory_space<vmem>>, vector<128x128xbf16>
    %cst_42 = arith.constant dense<0.000000e+00> : vector<64x128xf32>
    %92 = tpu.matmul %90, %91, %cst_42 {dimension_numbers = #tpu.dot_dimension_numbers<[1], [0], [0], [1], [0, 0, 1, 1], [], []>} : vector<64x128xbf16>, vector<128x128xbf16>, vector<64x128xf32> -> vector<64x128xf32>
    %93 = arith.addf %87, %92 : vector<64x128xf32>
    %c0_43 = arith.constant 0 : index
    %c0_44 = arith.constant 0 : index
    %94 = vector.load %arg7[%c0_43, %c0_44] : memref<1x128xf32, #tpu.memory_space<vmem>>, vector<1x128xf32>
    %95 = vector.broadcast %94 : vector<1x128xf32> to vector<64x128xf32>
    %96 = arith.mulf %93, %95 : vector<64x128xf32>
    %c0_45 = arith.constant 0 : index
    %c0_46 = arith.constant 0 : index
    %97 = vector.load %arg8[%c0_45, %c0_46] : memref<1x128xf32, #tpu.memory_space<vmem>>, vector<1x128xf32>
    %98 = vector.broadcast %97 : vector<1x128xf32> to vector<64x128xf32>
    %99 = arith.addf %96, %98 : vector<64x128xf32>
    %cst_47 = arith.constant 0.000000e+00 : f32
    %100 = vector.broadcast %cst_47 : f32 to vector<64x128xf32>
    %101 = arith.maximumf %99, %100 : vector<64x128xf32>
    %102 = arith.truncf %101 : vector<64x128xf32> to vector<64x128xbf16>
    %c0_48 = arith.constant 0 : index
    %c0_49 = arith.constant 0 : index
    %103 = vector.load %arg9[%c0_48, %c0_49] : memref<128x128xbf16, #tpu.memory_space<vmem>>, vector<128x128xbf16>
    %cst_50 = arith.constant dense<0.000000e+00> : vector<64x128xf32>
    %104 = tpu.matmul %102, %103, %cst_50 {dimension_numbers = #tpu.dot_dimension_numbers<[1], [0], [0], [1], [0, 0, 1, 1], [], []>} : vector<64x128xbf16>, vector<128x128xbf16>, vector<64x128xf32> -> vector<64x128xf32>
    %c0_51 = arith.constant 0 : index
    %c0_52 = arith.constant 0 : index
    %105 = vector.load %arg10[%c0_51, %c0_52] : memref<1x128xf32, #tpu.memory_space<vmem>>, vector<1x128xf32>
    %106 = vector.broadcast %105 : vector<1x128xf32> to vector<64x128xf32>
    %107 = arith.mulf %104, %106 : vector<64x128xf32>
    %c0_53 = arith.constant 0 : index
    %c0_54 = arith.constant 0 : index
    %108 = vector.load %arg11[%c0_53, %c0_54] : memref<1x128xf32, #tpu.memory_space<vmem>>, vector<1x128xf32>
    %109 = vector.broadcast %108 : vector<1x128xf32> to vector<64x128xf32>
    %110 = arith.addf %107, %109 : vector<64x128xf32>
    %111 = vector.shape_cast %3 : vector<2x4x8x128xf32> to vector<64x128xf32>
    %112 = arith.addf %110, %111 : vector<64x128xf32>
    %cst_55 = arith.constant 0.000000e+00 : f32
    %113 = vector.broadcast %cst_55 : f32 to vector<64x128xf32>
    %114 = arith.maximumf %112, %113 : vector<64x128xf32>
    %115 = vector.shape_cast %114 : vector<64x128xf32> to vector<2x4x8x128xf32>
    %c0_56 = arith.constant 0 : index
    %c0_57 = arith.constant 0 : index
    %c0_58 = arith.constant 0 : index
    %c0_59 = arith.constant 0 : index
    %116 = vector.load %arg12[%c0_56, %c0_57, %c0_58, %c0_59] : memref<2x4x8x128xf32, #tpu.memory_space<vmem>>, vector<2x4x8x128xf32>
    tpu.vector_store %arg12[%c0_56, %c0_57, %c0_58, %c0_59], %115 {strides = array<i32>} : memref<2x4x8x128xf32, #tpu.memory_space<vmem>>, vector<2x4x8x128xf32>,
    return
  }
  func.func @transform_0(%arg0: i32, %arg1: i32) -> (i32, i32, i32, i32) {
    %c0_i32 = arith.constant 0 : i32
    %c0_i32_0 = arith.constant 0 : i32
    %c0_i32_1 = arith.constant 0 : i32
    %c0_i32_2 = arith.constant 0 : i32
    return %arg0, %c0_i32, %c0_i32_0, %c0_i32_1 : i32, i32, i32, i32
  }
  func.func @transform_1(%arg0: i32, %arg1: i32) -> (i32, i32) {
    %c0_i32 = arith.constant 0 : i32
    %c0_i32_0 = arith.constant 0 : i32
    %c0_i32_1 = arith.constant 0 : i32
    return %c0_i32, %c0_i32_0 : i32, i32
  }
  func.func @transform_2(%arg0: i32, %arg1: i32) -> (i32, i32) {
    %c0_i32 = arith.constant 0 : i32
    %c0_i32_0 = arith.constant 0 : i32
    %c0_i32_1 = arith.constant 0 : i32
    return %c0_i32, %c0_i32_0 : i32, i32
  }
  func.func @transform_3(%arg0: i32, %arg1: i32) -> (i32, i32) {
    %c0_i32 = arith.constant 0 : i32
    %c0_i32_0 = arith.constant 0 : i32
    %c0_i32_1 = arith.constant 0 : i32
    return %c0_i32, %c0_i32_0 : i32, i32
  }
  func.func @transform_4(%arg0: i32, %arg1: i32) -> (i32, i32) {
    %c0_i32 = arith.constant 0 : i32
    %c0_i32_0 = arith.constant 0 : i32
    %c0_i32_1 = arith.constant 0 : i32
    return %c0_i32, %c0_i32_0 : i32, i32
  }
  func.func @transform_5(%arg0: i32, %arg1: i32) -> (i32, i32) {
    %c0_i32 = arith.constant 0 : i32
    %c0_i32_0 = arith.constant 0 : i32
    %c0_i32_1 = arith.constant 0 : i32
    return %c0_i32, %c0_i32_0 : i32, i32
  }
  func.func @transform_6(%arg0: i32, %arg1: i32) -> (i32, i32) {
    %c0_i32 = arith.constant 0 : i32
    %c0_i32_0 = arith.constant 0 : i32
    %c0_i32_1 = arith.constant 0 : i32
    return %c0_i32, %c0_i32_0 : i32, i32
  }
  func.func @transform_7(%arg0: i32, %arg1: i32) -> (i32, i32) {
    %c0_i32 = arith.constant 0 : i32
    %c0_i32_0 = arith.constant 0 : i32
    %c0_i32_1 = arith.constant 0 : i32
    return %c0_i32, %c0_i32_0 : i32, i32
  }
  func.func @transform_8(%arg0: i32, %arg1: i32) -> (i32, i32) {
    %c0_i32 = arith.constant 0 : i32
    %c0_i32_0 = arith.constant 0 : i32
    %c0_i32_1 = arith.constant 0 : i32
    return %c0_i32, %c0_i32_0 : i32, i32
  }
  func.func @transform_9(%arg0: i32, %arg1: i32) -> (i32, i32) {
    %c0_i32 = arith.constant 0 : i32
    %c0_i32_0 = arith.constant 0 : i32
    %c0_i32_1 = arith.constant 0 : i32
    return %c0_i32, %c0_i32_0 : i32, i32
  }
  func.func @transform_10(%arg0: i32, %arg1: i32) -> (i32, i32, i32, i32) {
    %c0_i32 = arith.constant 0 : i32
    %c0_i32_0 = arith.constant 0 : i32
    %c0_i32_1 = arith.constant 0 : i32
    return %arg0, %arg1, %c0_i32, %c0_i32_0 : i32, i32, i32, i32
  }
}

</mosaic_0001>

<bundles_post_ra>
// kernel: tpu_custom_call.1
= control target key start
LH: loop header
LB: loop body
LE: loop exit
PB: predicated region body
PF: predicated region fallthrough
CT: control target
= control target key end

     0   :  { %s3714_s0 = inlined_call_operand.hbm [shape: f32[4,8,8,128], index: 0, kind: input, shape index: {}]   ;;  %s3715_s1 = inlined_call_operand.hbm [shape: bf16[128,128], index: 1, kind: input, shape index: {}]   ;;  %s3716_s2 = inlined_call_operand.vmem [shape: f32[1,128], index: 2, kind: input, shape index: {}]   ;;  %s3717_s3 = inlined_call_operand.vmem [shape: f32[1,128], index: 3, kind: input, shape index: {}]   ;;  %s3718_s4 = inlined_call_operand.hbm [shape: bf16[1152,128], index: 4, kind: input, shape index: {}]   ;;  %s3719_s5 = inlined_call_operand.vmem [shape: f32[1,128], index: 5, kind: input, shape index: {}]   ;;  %s3720_s6 = inlined_call_operand.vmem [shape: f32[1,128], index: 6, kind: input, shape index: {}]   ;;  %s3721_s7 = inlined_call_operand.hbm [shape: bf16[128,128], index: 7, kind: input, shape index: {}]   ;;  %s3722_s8 = inlined_call_operand.vmem [shape: f32[1,128], index: 8, kind: input, shape index: {}]   ;;  %s3723_s9 = inlined_call_operand.vmem [shape: f32[1,128], index: 9, kind: input, shape index: {}]   ;;  %s3724_s10 = inlined_call_operand.hbm [shape: f32[4,8,8,128], index: 10, kind: output, shape index: {}]  }
   0x1   :  { %3734 = sst [smem:[#allocation25_spill]] %s3715_s1 }
   0x2   :  { %3735 = sst [smem:[#allocation26_spill]] %s3718_s4 }
   0x3   :  { %3736 = sst [smem:[#allocation27_spill]] %s3720_s6 }
   0x4   :  { %3737 = sst [smem:[#allocation28_spill]] %s3721_s7 }
   0x5   :  { %3738 = sst [smem:[#allocation29_spill]] %s3722_s8 }
   0x6   :  { %3739 = sst [smem:[#allocation30_spill]] %s3723_s9 }
   0x7   :  { %3740 = sst [smem:[#allocation31_spill]] %s3724_s10 }
   0x8   :  { %15 = vsyncpa [#allocation3], 0 }
   0x9   :  { %17 = vsyncpa [#allocation3 + $0x1], 0 }
   0xa   :  { %18 = vsyncpa [#allocation6], 0 }
   0xb   :  { %19 = vsyncpa [#allocation9], 0 }
   0xc   :  { %20 = vsyncpa [#allocation4], 0 }
   0xd   :  { %22 = vsyncpa [#allocation4 + $0x1], 0  ;;  %s3119_s13 = smov 0   ;;  %s3121_s14 = smov 0  }
   0xe   :  { %s3123_s15 = smov 0   ;;  %s3125_s16 = smov 0  }
   0xf   :  { %s3127_s17 = smov 0   ;;  %s3129_s18 = smov 0  }
  0x10   :  { %s3131_s19 = smov 0   ;;  %s3133_s20 = smov 0  }
  0x11   :  { %s3135_s21 = smov 0   ;;  %s3137_s22 = smov 0  }
  0x12   :  { %s3139_s23 = smov 0  }
  0x13 LB: > { %3741 = sst [smem:[#allocation17_spill]] %s3008_s13  ;;  %s2189_s24 = sadd.s32 4294967295, %s3048_s23   ;;  %s3048_s23 = sphi %s3139_s23, %s28_s23   ;;  %s3044_s22 = sphi %s3137_s22, %s3782_s22   ;;  %s3040_s21 = sphi %s3135_s21, %s3774_s21   ;;  %s3036_s20 = sphi %s3133_s20, %s3781_s20   ;;  %s3032_s19 = sphi %s3131_s19, %s3773_s19   ;;  %s3028_s18 = sphi %s3129_s18, %s3780_s18   ;;  %s3024_s17 = sphi %s3127_s17, %s3779_s17   ;;  %s3020_s16 = sphi %s3125_s16, %s3778_s16   ;;  %s3016_s15 = sphi %s3123_s15, %s3777_s15   ;;  %s3012_s14 = sphi %s3121_s14, %s3776_s14   ;;  %s3008_s13 = sphi %s3119_s13, %s3772_s13  }
  0x14   : > { %3742 = sst [smem:[#allocation18_spill]] %s3012_s14  ;;  %s2190_s25 = sadd.s32 4294967294, %s3048_s23  }
  0x15   : > { %3743 = sst [smem:[#allocation19_spill]] %s3036_s20  ;;  %p60_p0 = scmp.ne.s32.totalorder %s3024_s17, %s3020_s16 }
  0x16   : > { %3744 = sst [smem:[#allocation20_spill]] %s3040_s21  ;;  %p3175_p1 = scmp.eq.s32.totalorder %s2189_s24, 0 }
  0x17   : > { %p274_p2 = scmp.ne.s32.totalorder %s3016_s15, %s3012_s14  ;;  %p275_p3 = scmp.eq.s32.totalorder %s2189_s24, 3 }
  0x18   : > { %p3183_p4 = por %p3175_p1, %p60_p0  ;;  %p280_p5 = scmp.ne.s32.totalorder %s3012_s14, %s3008_s13 }
  0x19   : > { %p3189_p6 = por %p275_p3, %p274_p2  ;;  %p281_p7 = scmp.eq.s32.totalorder %s2190_s25, 3 }
  0x1a   : > { %p2191_p8 = scmp.ge.s32.totalorder %s3048_s23, 1  ;;  %p288_p9 = scmp.lt.s32.totalorder %s3048_s23, 5 }
  0x1b   : > { %s3747_s28 = scalar_select %p3189_p6, 1, 0 }
  0x1c   : > { %p3195_p10 = por %p281_p7, %p280_p5  ;;  %p3199_p11 = pnand %p2191_p8, %p288_p9 }
  0x1d   : > { %3748 = sst [smem:[#allocation21_spill]] %s3747_s28  ;;  %s3050_s24 = smov [#allocation5]  }
  0x1e   : > { %s3749_s29 = scalar_select %p3195_p10, 1, 0 }
  0x1f   : > { %s3752_s1 = sld [smem:[#allocation25_spill]]  ;;  %p2684_p12 = pneg %p3199_p11 }
  0x20   : > { %3750 = sst [smem:[#allocation22_spill]] %s3749_s29  ;;  %s301_s25 = sshll.u32 %s3050_s24, 4  ;;  %s302_s25 = int_to_ptr.vmem [resolvable:$true] %s301_s25 }
  0x21   : > { %p3210_p13 = pnand %p2684_p12, %p3175_p1  ;;  %s3754_s4 = sld [smem:[#allocation26_spill]] }
  0x22   : > { %s3051_s12 = smov 64   ;;  %s3755_s7 = sld [smem:[#allocation28_spill]] }
  0x23   : > { %s3053_s10 = smov [#allocation7]   ;;  %s40_s28 = sadd.s32 1, %s3044_s22 }
  0x24   : > { %s321_s29 = sshll.u32 %s3053_s10, 4  ;;  %p54_p2 = scmp.ne.s32.totalorder %s3028_s18, %s3024_s17  ;;  %s322_s29 = int_to_ptr.vmem [resolvable:$true] %s321_s29 }
  0x25   : > { %s299_s16 = sshll.u32 %s3752_s1, 4  ;;  %s3052_s1 = smov 4   ;;  %s300_s16 = int_to_ptr.hbm [resolvable:$true] %s299_s16 }
  0x26   : > { %2687 = dma.hbm_to_vmem [thread:$0]  (!%p3210_p13), %s300_s16, 1024, %s302_s25, [#allocation6], %s3051_s12, %s3051_s12, %s3052_s1  }
  0x27   : > { %s319_s11 = sshll.u32 %s3754_s4, 4  ;;  %s3054_s4 = smov [#allocation8]   ;;  %s320_s11 = int_to_ptr.hbm [resolvable:$true] %s319_s11 }
  0x28   : > { %s339_s20 = sshll.u32 %s3755_s7, 4  ;;  %s341_s9 = sshll.u32 %s3054_s4, 4  ;;  %s340_s20 = int_to_ptr.hbm [resolvable:$true] %s339_s20  ;;  %s342_s9 = int_to_ptr.vmem [resolvable:$true] %s341_s9 }
  0x29   : > { %2690 = dma.hbm_to_vmem [thread:$0]  (!%p3210_p13), %s320_s11, 9216, %s322_s29, [#allocation6], %s3051_s12, %s3051_s12, %s3052_s1  }
  0x2a   : > { %2693 = dma.hbm_to_vmem [thread:$0]  (!%p3210_p13), %s340_s20, 1024, %s342_s9, [#allocation9], %s3051_s12, %s3051_s12, %s3052_s1  }
  0x2b   : > { %s37_s16 = sadd.s32 1, %s3040_s21  ;;  %s47_s25 = sadd.s32 1, %s3028_s18 }
  0x2c   : > { %p38_p0 = scmp.ge.s32.totalorder %s37_s16, 2  ;;  %p55_p3 = scmp.eq.s32.totalorder %s3048_s23, 0 }
  0x2d   : > { %s264_s1 = sadd.s32 1, %s3016_s15  ;;  %p2705_p8 = scmp.lt.s32.totalorder %s3048_s23, 4 }
  0x2e   : > { %s3784_s16 = smov (%p38_p0, %s37_s16), 0  ;;  %s3786_s28 = smov (!%p38_p0, %s40_s28), %s3044_s22 }
  0x2f   : > { %3756 = sst [smem:[#allocation23_spill]] %s3784_s16  ;;  %p3235_p5 = por %p55_p3, %p54_p2 }
  0x30   : > { %s260_s13 = ssub.s32 %s3040_s21, %s3784_s16  ;;  %p42_p7 = scmp.ge.s32.totalorder %s3786_s28, 2 }
  0x31   : > { %s361_s9 = sand.u32 1, %s3028_s18   ;;  %s2571_s24 = sshll.u32 %s3044_s22, 7 }
  0x32   : > { %s3788_s28 = smov (%p42_p7, %s3786_s28), 0  ;;  %s2196_s20 = sshll.u32 %s361_s9, 7 }
  0x33   : > { %3758 = sst [smem:[#allocation24_spill]] %s3788_s28  ;;  %s44_s11 = ssub.s32 %s3044_s22, %s3788_s28 }
  0x34   : > { %p45_p9 = scmp.eq.s32.totalorder %s44_s11, 0  ;;  %s261_s12 = sor.u32 %s260_s13, %s44_s11 }
  0x35   : > { %p262_p12 = scmp.eq.s32.totalorder %s261_s12, 0  ;;  %s371_s21 = scalar_lea.hbm %s3714_s0, %s2571_s24 }
  0x36   : > { %s3250_s10 = scalar_select %p45_p9, %s3028_s18, %s47_s25  }
  0x37   : > { %s3253_s29 = scalar_select %p262_p12, %s3016_s15, %s264_s1  }
  0x38   : > { %s365_s8 = scalar_lea.vmem [#allocation2], %s2196_s20  ;;  %s372_s6 = sshll.u32 %s371_s21, 4  ;;  %s373_s6 = int_to_ptr.hbm [resolvable:$true] %s372_s6 }
  0x39   : > { %s374_s14 = sshll.u32 %s365_s8, 4  ;;  %p2695_p13 = pnand %p2705_p8, %p3235_p5  ;;  %s375_s14 = int_to_ptr.vmem [resolvable:$true] %s374_s14 }
  0x3a   : > { %s362_s28 = scalar_lea.sflag [#allocation3], %s361_s9  ;;  %s3055_s13 = smov 128  }
  0x3b   : > { %s3056_s11 = smov 8   ;;  %386 = sbr.rel (%p3199_p11) target bundleno = 761 (0x2f9), region = 60 }
  0x3c   : > { %2697 = dma.hbm_to_vmem [thread:$0]  (!%p2695_p13), %s373_s6, 2048, %s375_s14, %s362_s28, %s3055_s13, %s3055_s13, %s3056_s11  }
  0x3d   : > { %s388_s25 = sand.u32 (!%p3199_p11), 1, %s3024_s17  }
  0x3e   : > { %s2201_s7 = sshll.u32 (!%p3199_p11), %s388_s25, 7  ;;  %s389_s16 = scalar_lea.sflag (!%p3199_p11), [#allocation3], %s388_s25 }
  0x3f   : > { %s3265_s1 = scalar_lea.vmem (!%p3199_p11), [#allocation2], %s2201_s7 }
  0x40   : > { %2991 = dma.done.wait (%p3183_p4), %s389_s16, 2048  }
  0x41   : > { %2993 = vsyncadd (%p3183_p4), %s389_s16, 4294965248 }
  0x42   : > { %2995 = dma.done.wait (%p3175_p1), [#allocation6], 10240  }
  0x43   : > { %2997 = vsyncadd (%p3175_p1), [#allocation6], 4294957056 }
  0x44   : > { %2999 = dma.done.wait (%p3175_p1), [#allocation9], 1024  }
  0x45   : > { %3001 = vsyncadd (%p3175_p1), [#allocation9], 4294966272  ;;  %v2580_v0 = vld [vmem:[#allocation5 + $0x38] sm:$0xff]  ;;  %v2579_v1 = vld [vmem:[#allocation5 + $0x30] sm:$0xff]  ;;  %s3280_s6 = sshll.u32 %s3032_s19, 2  ;;  %s2572_s14 = sshll.u32 %s3032_s19, 5 }
  0x46   : > { %544 = vmatpush.bf16.msra.mxu0 %v2580_v0  ;;  %v2578_v2 = vld [vmem:[#allocation5 + $0x28] sm:$0xff]  ;;  %s2208_s8 = sadd.s32 4294967295, %s3280_s6  ;;  %v2577_v3 = vld [vmem:[#allocation5 + $0x20] sm:$0xff]  ;;  %v2576_v4 = vld [vmem:[#allocation5 + $0x18] sm:$0xff]  ;;  %s3285_s26 = scalar_lea.vmem %s3265_s1, %s2572_s14 [#allocation2]  ;;  %vm737_vm0 = vcmask 1040384   ;;  %vm990_vm2 = vcmask 1043456  }
  0x47   : > { %p461_p4 = scmp.gt.s32.totalorder %s2208_s8, 0  ;;  %v2575_v5 = vld [vmem:[#allocation5 + $0x10] sm:$0xff]  ;;  %v2574_v6 = vld [vmem:[#allocation5 + $0x8] sm:$0xff]  ;;  %v2573_v7 = vld [vmem:[#allocation5] sm:$0xff]  ;;  %s463_s30 = sadd.s32 4, %s3280_s6 }
  0x48   : > { %v452_v8 = vld [vmem:[%s3285_s26] sm:$0xff]  ;;  %v453_v11 = vld [vmem:[%s3285_s26 + $0x8] sm:$0xff]  ;;  %v454_v12 = vld [vmem:[%s3285_s26 + $0x10] sm:$0xff]  ;;  %p464_p1 = scmp.lt.s32.totalorder %s463_s30, 7  ;;  %p627_p11 = scmp.gt.s32.totalorder %s3032_s19, 0 }
  0x49   : > { %s3790_s8 = smov (!%p461_p4, %s2208_s8), 0  ;;  %v475_v13 = vpack.c.bf16 %v454_v12, %v453_v11  ;;  %v455_v14 = vld [vmem:[%s3285_s26 + $0x18] sm:$0xff]  ;;  %v456_v17 = vld [vmem:[%s3285_s26 + $0x40] sm:$0xff]  ;;  %v2595_v21 = vld [vmem:[#allocation7 + $0x70] sm:$0xff]  ;;  %vm738_vm1 = vsmask.f32 256 }
  0x4a   : > { %545 = vmatpush.bf16.msra.mxu0 %v2579_v1  ;;  %s2209_s21 = sshll.u32 %s3790_s8, 3  ;;  %s3792_s30 = smov (!%p464_p1, %s463_s30), 7  ;;  %v2596_v20 = vld [vmem:[#allocation7 + $0x78] sm:$0xff]  ;;  %v2594_v22 = vld [vmem:[#allocation7 + $0x68] sm:$0xff]  ;;  %v458_v24 = vld [vmem:[%s3285_s26 + $0x50] sm:$0xff] }
  0x4b   : > { %s467_s27 = scalar_lea.vmem %s3265_s1, %s2209_s21 [#allocation2]  ;;  %s2210_s28 = sshll.u32 %s3792_s30, 3  ;;  %836 = vmatpush.bf16.msra.mxu1 %v2596_v20  ;;  %v457_v23 = vld [vmem:[%s3285_s26 + $0x48] sm:$0xff]  ;;  %v459_v26 = vld [vmem:[%s3285_s26 + $0x58] sm:$0xff]  ;;  %v2593_v31 = vld [vmem:[#allocation7 + $0x60] sm:$0xff]  ;;  %vm991_vm3 = vsmask.f32 3328 }
  0x4c   : > { %v468_v9 = vld [vmem:[%s467_s27] sm:$0xff]  ;;  %s471_s4 = scalar_lea.vmem %s3265_s1, %s2210_s28 [#allocation2]  ;;  %v478_v25 = vpack.c.bf16 %v458_v24, %v457_v23  ;;  %v2588_v29 = vld [vmem:[#allocation7 + $0x38] sm:$0xff]  ;;  %v2587_v32 = vld [vmem:[#allocation7 + $0x30] sm:$0xff]  ;;  %p629_p0 = scmp.lt.s32.totalorder %s3032_s19, 1 }
  0x4d   : > { %v474_v10 = vpack.c.bf16 %v452_v8, %v468_v9  ;;  %v472_v15 = vld [vmem:[%s471_s4] sm:$0xff]  ;;  %v2604_v30 = vld [vmem:[#allocation7 + $0xb8] sm:$0xff]  ;;  %937 = vmatpush.bf16.msra.mxu2 %v2588_v29  ;;  %v2603_v33 = vld [vmem:[#allocation7 + $0xb0] sm:$0xff]  ;;  %s3309_s13 = scalar_select %p627_p11, 1.0, 0.0 }
  0x4e   : > { %546 = vmatpush.bf16.msra.mxu0 %v2578_v2  ;;  %v476_v16 = vpack.c.bf16 %v472_v15, %v455_v14  ;;  %v469_v18 = vld [vmem:[%s467_s27 + $0x40] sm:$0xff]  ;;  %1089 = vmatpush.bf16.msra.mxu3 %v2604_v30  ;;  %v2592_v34 = vld [vmem:[#allocation7 + $0x58] sm:$0xff]  ;;  %v2586_v35 = vld [vmem:[#allocation7 + $0x28] sm:$0xff]  ;;  %s3373_s11 = scalar_select %p629_p0, 1.0, 0.0 }
  0x4f   : > { %v477_v19 = vpack.c.bf16 %v456_v17, %v469_v18  ;;  %837 = vmatpush.bf16.msra.mxu1 %v2595_v21  ;;  %v473_v27 = vld [vmem:[%s471_s4 + $0x40] sm:$0xff]  ;;  %v2602_v36 = vld [vmem:[#allocation7 + $0xa8] sm:$0xff]  ;;  %v2591_v37 = vld [vmem:[#allocation7 + $0x50] sm:$0xff]  ;;  %v631_v60 = vstv %s3309_s13  ;;  %s3763_s1 = sld [smem:[#allocation27_spill]] }
  0x50   : > { %v479_v28 = vpack.c.bf16 %v473_v27, %v459_v26  ;;  %v2585_v38 = vld [vmem:[#allocation7 + $0x20] sm:$0xff]  ;;  %v2590_v40 = vld [vmem:[#allocation7 + $0x48] sm:$0xff]  ;;  %v2584_v41 = vld [vmem:[#allocation7 + $0x18] sm:$0xff]  ;;  %s3764_s8 = sld [smem:[#allocation18_spill]] }
  0x51   : > { %938 = vmatpush.bf16.msra.mxu2 %v2587_v32  ;;  %v2601_v39 = vld [vmem:[#allocation7 + $0xa0] sm:$0xff]  ;;  %v2600_v42 = vld [vmem:[#allocation7 + $0x98] sm:$0xff]  ;;  %v2583_v45 = vld [vmem:[#allocation7 + $0x10] sm:$0xff]  ;;  %s3765_s30 = sld [smem:[#allocation29_spill]] }
  0x52   : > { %547 = vmatpush.bf16.msra.mxu0 %v2577_v3  ;;  %1090 = vmatpush.bf16.msra.mxu3 %v2603_v33  ;;  %v2636_v43 = vld [vmem:[#allocation7 + $0x1b8] sm:$0xff]  ;;  %v2589_v44 = vld [vmem:[#allocation7 + $0x40] sm:$0xff]  ;;  %v2599_v46 = vld [vmem:[#allocation7 + $0x90] sm:$0xff]  ;;  %s3766_s9 = sld [smem:[#allocation30_spill]] }
  0x53   : > { %838 = vmatpush.bf16.msra.mxu1 %v2594_v22  ;;  %v2635_v47 = vld [vmem:[#allocation7 + $0x1b0] sm:$0xff]  ;;  %v2582_v48 = vld [vmem:[#allocation7 + $0x8] sm:$0xff]  ;;  %v2581_v51 = vld [vmem:[#allocation7] sm:$0xff] }
  0x54   : > { %v2598_v49 = vld [vmem:[#allocation7 + $0x88] sm:$0xff]  ;;  %v2597_v52 = vld [vmem:[#allocation7 + $0x80] sm:$0xff]  ;;  %v2632_v57 = vld [vmem:[#allocation7 + $0x198] sm:$0xff] }
  0x55   : > { %939 = vmatpush.bf16.msra.mxu2 %v2586_v35  ;;  %v2634_v50 = vld [vmem:[#allocation7 + $0x1a8] sm:$0xff]  ;;  %v2633_v53 = vld [vmem:[#allocation7 + $0x1a0] sm:$0xff]  ;;  %v2631_v61 = vld [vmem:[#allocation7 + $0x190] sm:$0xff] }
  0x56   : > { %548 = vmatpush.bf16.msra.mxu0 %v2576_v4  ;;  %1091 = vmatpush.bf16.msra.mxu3 %v2602_v36  ;;  %v3302_v54 = vld [vmem:[%s3716_s2] ss:$0 sm:$0xff]  ;;  %v2630_v1 = vld [vmem:[#allocation7 + $0x188] sm:$0xff]  ;;  %vm3325_vm4 = vmand %vm737_vm0, %vm738_vm1  ;;  %s442_s14 = sand.u32 1, %s3764_s8  }
  0x57   : > { %839 = vmatpush.bf16.msra.mxu1 %v2593_v31  ;;  %v3307_v55 = vld [vmem:[%s3717_s3] ss:$0 sm:$0xff]  ;;  %vm3329_vm5 = vmand %vm990_vm2, %vm991_vm3  ;;  %v2620_v27 = vld [vmem:[#allocation7 + $0x138] sm:$0xff]  ;;  %s2205_s20 = sshll.u32 %s442_s14, 6  ;;  %s2026_s24 = scalar_lea.sflag [#allocation4], %s442_s14 }
  0x58   : > { %v2645_v26 = vld [vmem:[#allocation7 + $0x200] sm:$0xff]  ;;  %s3638_s12 = scalar_lea.vmem [#allocation10], %s2205_s20 }
  0x59   : > { %940 = vmatpush.bf16.msra.mxu2 %v2585_v38 }
  0x5a   : > { %549 = vmatpush.bf16.msra.mxu0 %v2575_v5  ;;  %1092 = vmatpush.bf16.msra.mxu3 %v2601_v39 }
  0x5b   : > { %840 = vmatpush.bf16.msra.mxu1 %v2592_v34 }
  0x5d   : > { %941 = vmatpush.bf16.msra.mxu2 %v2584_v41 }
  0x5e   : > { %550 = vmatpush.bf16.msra.mxu0 %v2574_v6  ;;  %1093 = vmatpush.bf16.msra.mxu3 %v2600_v42  ;;  %v2629_v6 = vld [vmem:[#allocation7 + $0x180] sm:$0xff] }
  0x5f   : > { %841 = vmatpush.bf16.msra.mxu1 %v2591_v37 }
  0x61   : > { %942 = vmatpush.bf16.msra.mxu2 %v2583_v45 }
  0x62   : > { %551 = vmatpush.bf16.msra.mxu0 %v2573_v7  ;;  %1094 = vmatpush.bf16.msra.mxu3 %v2599_v46 }
  0x63   : > { %842 = vmatpush.bf16.msra.mxu1 %v2590_v40 }
  0x65   : > { %552 = vmatmul.bf16.vlgmr.msra.gmra.mxu0 %v474_v10  ;;  %943 = vmatpush.bf16.msra.mxu2 %v2582_v48 }
  0x66   : > { %1589 = vmatpush.bf16.msrb.mxu0 %v2636_v43  ;;  %1095 = vmatpush.bf16.msra.mxu3 %v2598_v49 }
  0x67   : > { %843 = vmatpush.bf16.msra.mxu1 %v2589_v44 }
  0x69   : > { %944 = vmatpush.bf16.msra.mxu2 %v2581_v51 }
  0x6a   : > { %1590 = vmatpush.bf16.msrb.mxu0 %v2635_v47  ;;  %1096 = vmatpush.bf16.msra.mxu3 %v2597_v52 }
  0x6d   : > { %1335 = vmatpush.bf16.msrb.mxu2 %v2620_v27 }
  0x6e   : > { %1591 = vmatpush.bf16.msrb.mxu0 %v2634_v50 }
  0x72   : > { %1592 = vmatpush.bf16.msrb.mxu0 %v2633_v53 }
  0x75   : > { %557 = vmatmul.bf16.gmra.mxu0 %v475_v13 }
  0x76   : > { %1593 = vmatpush.bf16.msrb.mxu0 %v2632_v57 }
  0x7a   : > { %1594 = vmatpush.bf16.msrb.mxu0 %v2631_v61 }
  0x7e   : > { %1595 = vmatpush.bf16.msrb.mxu0 %v2630_v1 }
  0x82   : > { %1596 = vmatpush.bf16.msrb.mxu0 %v2629_v6 }
  0x85   : > { %562 = vmatmul.bf16.gmra.mxu0 %v476_v16 }
  0x95   : > { %567 = vmatmul.bf16.gmra.mxu0 %v477_v19 }
  0xa5   : > { %572 = vmatmul.bf16.gmra.mxu0 %v478_v25 }
  0xb5   : > { %577 = vmatmul.bf16.gmra.mxu0 %v479_v28  ;;  %v2612_v28 = vld [vmem:[#allocation7 + $0xf8] sm:$0xff] }
  0xb6   : > { %1226 = vmatpush.bf16.msrb.mxu1 %v2612_v28  ;;  %v2618_v28 = vld [vmem:[#allocation7 + $0x128] sm:$0xff] }
  0xe2   : > { %v553_v56 = vpop.f32.mrf.mxu0 }
  0xe3   : > { %v587_v58 = vmul.f32 %v3302_v54, %v553_v56 }
  0xe5   : > { %v603_v59 = vadd.f32 %v3307_v55, %v587_v58 }
  0xe7   : > { %v615_v62 = vmax.f32 %v603_v59, 0.0 }
  0xe9   : > { %v632_v63 = vmul.f32 %v631_v60, %v615_v62 }
  0xea   : > { %v555_v0 = vpop.f32.mrf.mxu0 }
  0xeb   : > { %v588_v2 = vmul.f32 %v3302_v54, %v555_v0  ;;  %v634_v3 = vpack.c.bf16 %v632_v63, %v632_v63 }
  0xed   : > { %v604_v4 = vadd.f32 %v3307_v55, %v588_v2  ;;  %v657_v5 = vunpack.c.l.b16 %v634_v3  ;;  %v2619_v2 = vld [vmem:[#allocation7 + $0x130] sm:$0xff] }
  0xee   : > { %v2611_v3 = vld [vmem:[#allocation7 + $0xf0] sm:$0xff]  ;;  %1336 = vmatpush.bf16.msrb.mxu2 %v2619_v2 }
  0xef   : > { %v616_v7 = vmax.f32 %v604_v4, 0.0  ;;  %v665_v8 = vpack.c.b16 %v657_v5, %v657_v5  ;;  %1227 = vmatpush.bf16.msrb.mxu1 %v2611_v3 }
  0xf1   : > { %v636_v9 = vpack.c.bf16 %v616_v7, %v616_v7  ;;  %v674_v10 = vshrl.u32 %v665_v8, 16  ;;  %v677_v11 = vshll.u32 %v665_v8, 16 }
  0xf2   : > { %v558_v12 = vpop.f32.mrf.mxu0  ;;  %1337 = vmatpush.bf16.msrb.mxu2 %v2618_v28  ;;  %v2606_v28 = vld [vmem:[#allocation7 + $0xc8] sm:$0xff] }
  0xf3   : > { %v3318_v13 = vunpack.c.l.b16 %v636_v9  ;;  %v589_v14 = vmul.f32 %v3302_v54, %v558_v12  ;;  %v676_v15 = vrot.slane %v674_v10, 7  ;;  %v966_v16 = vrot.slane %v677_v11, 1 }
  0xf5   : > { %v666_v17 = vpack.c.b16 %v3318_v13, %v3318_v13  ;;  %v605_v18 = vadd.f32 %v3307_v55, %v589_v14  ;;  %v780_v19 = vpack.c.b16 %v3318_v13, %v657_v5  ;;  %v679_v20 = vor.u32 %v677_v11, %v676_v15 }
  0xf6   : > { %v967_v22 = vor.u32 %v966_v16, %v674_v10 }
  0xf7   : > { %v617_v23 = vmax.f32 %v605_v18, 0.0  ;;  %844 = vmatmul.bf16.vlgmr.msra.gmra.mxu1 %v780_v19  ;;  %v681_v24 = vshrl.u32 %v666_v17, 16  ;;  %v684_v25 = vshll.u32 %v666_v17, 16  ;;  %v740_v31 = vsel %vm3325_vm4, 0, %v679_v20 }
  0xf8   : > { %v993_v34 = vsel %vm3329_vm5, %v967_v22, 0  ;;  %v873_v39 = vunpack.c.l.b16 %v740_v31  ;;  %v644_v22 = vstv %s3373_s11 }
  0xf9   : > { %v637_v29 = vpack.c.bf16 %v617_v23, %v617_v23  ;;  %v683_v30 = vrot.slane %v681_v24, 7  ;;  %v968_v32 = vrot.slane %v684_v25, 1  ;;  %v1025_v45 = vunpack.c.l.b16 %v993_v34 }
  0xfa   : > { %v560_v33 = vpop.f32.mrf.mxu0 }
  0xfb   : > { %v3337_v35 = vunpack.c.l.b16 %v637_v29  ;;  %v590_v36 = vmul.f32 %v3302_v54, %v560_v33  ;;  %v686_v37 = vor.u32 %v684_v25, %v683_v30  ;;  %v969_v38 = vor.u32 %v968_v32, %v681_v24  ;;  %v2610_v29 = vld [vmem:[#allocation7 + $0xe8] sm:$0xff] }
  0xfc   : > { %1228 = vmatpush.bf16.msrb.mxu1 %v2610_v29 }
  0xfd   : > { %v667_v40 = vpack.c.b16 %v3337_v35, %v3337_v35  ;;  %v606_v41 = vadd.f32 %v3307_v55, %v590_v36  ;;  %v741_v42 = vsel %vm3325_vm4, 0, %v686_v37  ;;  %v994_v43 = vsel %vm3329_vm5, %v969_v38, 0 }
  0xfe   : > { %v3347_v44 = vunpack.c.l.b16 %v741_v42  ;;  %v3349_v46 = vunpack.c.l.b16 %v994_v43  ;;  %v1279_v47 = vpack.c.b16 %v3337_v35, %v3318_v13  ;;  %v2628_v43 = vld [vmem:[#allocation7 + $0x178] sm:$0xff] }
  0xff   : > { %v618_v48 = vmax.f32 %v606_v41, 0.0  ;;  %v688_v49 = vshrl.u32 %v667_v40, 16  ;;  %v691_v50 = vshll.u32 %v667_v40, 16  ;;  %1456 = vmatpush.bf16.msrb.mxu3 %v2628_v43 }
 0x100   : > { %v881_v51 = vpack.c.b16 %v3347_v44, %v873_v39  ;;  %v1033_v52 = vpack.c.b16 %v3349_v46, %v1025_v45 }
 0x101   : > { %v638_v53 = vpack.c.bf16 %v618_v48, %v618_v48  ;;  %v970_v56 = vrot.slane %v691_v50, 1  ;;  %v690_v58 = vrot.slane %v688_v49, 7 }
 0x102   : > { %v563_v57 = vpop.f32.mrf.mxu0  ;;  %945 = vmatmul.bf16.vlgmr.msra.gmra.mxu2 %v881_v51  ;;  %1097 = vmatmul.bf16.vlgmr.msra.gmra.mxu3 %v1033_v52 }
 0x103   : > { %v3355_v59 = vunpack.c.l.b16 %v638_v53  ;;  %v591_v61 = vmul.f32 %v3302_v54, %v563_v57  ;;  %v971_v62 = vor.u32 %v970_v56, %v688_v49  ;;  %v693_v4 = vor.u32 %v691_v50, %v690_v58  ;;  %v2609_v49 = vld [vmem:[#allocation7 + $0xe0] sm:$0xff]  ;;  %v2627_v58 = vld [vmem:[#allocation7 + $0x170] sm:$0xff] }
 0x104   : > { %v2617_v56 = vld [vmem:[#allocation7 + $0x120] sm:$0xff]  ;;  %1229 = vmatpush.bf16.msrb.mxu1 %v2609_v49  ;;  %1457 = vmatpush.bf16.msrb.mxu3 %v2627_v58 }
 0x105   : > { %v668_v63 = vpack.c.b16 %v3355_v59, %v3355_v59  ;;  %v607_v0 = vadd.f32 %v3307_v55, %v591_v61  ;;  %v3364_v1 = vpack.c.b16 %v3355_v59, %v3337_v35  ;;  %v995_v5 = vsel %vm3329_vm5, %v971_v62, 0  ;;  %1338 = vmatpush.bf16.msrb.mxu2 %v2617_v56 }
 0x106   : > { %v3369_v9 = vunpack.c.l.b16 %v995_v5  ;;  %v742_v16 = vsel %vm3325_vm4, 0, %v693_v4 }
 0x107   : > { %v619_v6 = vmax.f32 %v607_v0, 0.0  ;;  %849 = vmatmul.bf16.gmra.mxu1 %v3364_v1  ;;  %v695_v7 = vshrl.u32 %v668_v63, 16  ;;  %v698_v8 = vshll.u32 %v668_v63, 16  ;;  %v3390_v30 = vunpack.c.l.b16 %v742_v16  ;;  %v2608_v0 = vld [vmem:[#allocation7 + $0xd8] sm:$0xff]  ;;  %v2607_v16 = vld [vmem:[#allocation7 + $0xd0] sm:$0xff] }
 0x108   : > { %v1400_v14 = vpack.c.b16 %v3369_v9, %v3349_v46  ;;  %1230 = vmatpush.bf16.msrb.mxu1 %v2608_v0  ;;  %v2605_v0 = vld [vmem:[#allocation7 + $0xc0] sm:$0xff] }
 0x109   : > { %v639_v10 = vpack.c.bf16 %v619_v6, %v619_v6  ;;  %v697_v11 = vrot.slane %v695_v7, 7  ;;  %v972_v12 = vrot.slane %v698_v8, 1 }
 0x10a   : > { %v565_v15 = vpop.f32.mrf.mxu0 }
 0x10b   : > { %v3379_v17 = vunpack.c.l.b16 %v639_v10  ;;  %v592_v18 = vmul.f32 %v3302_v54, %v565_v15  ;;  %v700_v19 = vor.u32 %v698_v8, %v697_v11  ;;  %v973_v20 = vor.u32 %v972_v12, %v695_v7  ;;  %v2626_v10 = vld [vmem:[#allocation7 + $0x168] sm:$0xff] }
 0x10c   : > { %1458 = vmatpush.bf16.msrb.mxu3 %v2626_v10  ;;  %1231 = vmatpush.bf16.msrb.mxu1 %v2607_v16  ;;  %v2623_v10 = vld [vmem:[#allocation7 + $0x150] sm:$0xff]  ;;  %v2613_v16 = vld [vmem:[#allocation7 + $0x100] sm:$0xff] }
 0x10d   : > { %v1130_v23 = vpack.c.b16 %v3379_v17, %v3379_v17  ;;  %v608_v24 = vadd.f32 %v3307_v55, %v592_v18  ;;  %v743_v25 = vsel %vm3325_vm4, 0, %v700_v19  ;;  %v996_v27 = vsel %vm3329_vm5, %v973_v20, 0 }
 0x10e   : > { %v3392_v31 = vunpack.c.l.b16 %v743_v25  ;;  %v3394_v32 = vunpack.c.l.b16 %v996_v27  ;;  %v1280_v33 = vpack.c.b16 %v3379_v17, %v3355_v59  ;;  %v2616_v25 = vld [vmem:[#allocation7 + $0x118] sm:$0xff] }
 0x10f   : > { %v620_v34 = vmax.f32 %v608_v24, 0.0  ;;  %v1136_v36 = vshll.u32 %v1130_v23, 16  ;;  %v1133_v39 = vshrl.u32 %v1130_v23, 16  ;;  %1339 = vmatpush.bf16.msrb.mxu2 %v2616_v25 }
 0x110   : > { %v882_v37 = vpack.c.b16 %v3392_v31, %v3390_v30  ;;  %v3402_v38 = vpack.c.b16 %v3394_v32, %v3369_v9  ;;  %1232 = vmatpush.bf16.msrb.mxu1 %v2606_v28 }
 0x111   : > { %v645_v40 = vmul.f32 %v644_v22, %v620_v34  ;;  %v1372_v41 = vrot.slane %v1136_v36, 1  ;;  %v1135_v51 = vrot.slane %v1133_v39, 7 }
 0x112   : > { %v568_v42 = vpop.f32.mrf.mxu0  ;;  %950 = vmatmul.bf16.gmra.mxu2 %v882_v37  ;;  %1102 = vmatmul.bf16.gmra.mxu3 %v3402_v38 }
 0x113   : > { %v647_v45 = vpack.c.bf16 %v645_v40, %v645_v40  ;;  %v593_v48 = vmul.f32 %v3302_v54, %v568_v42  ;;  %1597 = vmatmul.bf16.vlgmr.msrb.gmra.mxu0 %v882_v37  ;;  %v1373_v50 = vor.u32 %v1372_v41, %v1133_v39  ;;  %v1138_v3 = vor.u32 %v1136_v36, %v1135_v51  ;;  %v2615_v37 = vld [vmem:[#allocation7 + $0x110] sm:$0xff]  ;;  %v2624_v51 = vld [vmem:[#allocation7 + $0x158] sm:$0xff] }
 0x114   : > { %1340 = vmatpush.bf16.msrb.mxu2 %v2615_v37  ;;  %1233 = vmatpush.bf16.msrb.mxu1 %v2605_v0 }
 0x115   : > { %v3408_v52 = vunpack.c.l.b16 %v647_v45  ;;  %v609_v53 = vadd.f32 %v3307_v55, %v593_v48  ;;  %v1378_v57 = vsel %vm3329_vm5, %v1373_v50, 0  ;;  %v1148_v19 = vsel %vm3325_vm4, 0, %v1138_v3 }
 0x116   : > { %v3413_v61 = vunpack.c.l.b16 %v1378_v57  ;;  %v3431_v40 = vunpack.c.l.b16 %v1148_v19 }
 0x117   : > { %v1497_v62 = vpack.c.b16 %v3408_v52, %v3408_v52  ;;  %v621_v63 = vmax.f32 %v609_v53, 0.0  ;;  %v1642_v2 = vpack.c.b16 %v3408_v52, %v3379_v17 }
 0x118   : > { %v1401_v4 = vpack.c.b16 %v3413_v61, %v3394_v32 }
 0x119   : > { %v1500_v5 = vshrl.u32 %v1497_v62, 16  ;;  %v1503_v6 = vshll.u32 %v1497_v62, 16  ;;  %v633_v7 = vmul.f32 %v631_v60, %v621_v63  ;;  %v2625_v60 = vld [vmem:[#allocation7 + $0x160] sm:$0xff]  ;;  %v2614_v63 = vld [vmem:[#allocation7 + $0x108] sm:$0xff] }
 0x11a   : > { %v570_v8 = vpop.f32.mrf.mxu0  ;;  %1459 = vmatpush.bf16.msrb.mxu3 %v2625_v60  ;;  %1341 = vmatpush.bf16.msrb.mxu2 %v2614_v63 }
 0x11b   : > { %v594_v11 = vmul.f32 %v3302_v54, %v570_v8  ;;  %v1502_v12 = vrot.slane %v1500_v5, 7  ;;  %v635_v15 = vpack.c.bf16 %v633_v7, %v633_v7  ;;  %v1731_v18 = vrot.slane %v1503_v6, 1 }
 0x11d   : > { %v610_v20 = vadd.f32 %v3307_v55, %v594_v11  ;;  %v1505_v23 = vor.u32 %v1503_v6, %v1502_v12  ;;  %v661_v24 = vunpack.c.l.b16 %v635_v15  ;;  %v1732_v27 = vor.u32 %v1731_v18, %v1500_v5  ;;  %v2622_v18 = vld [vmem:[#allocation7 + $0x148] sm:$0xff] }
 0x11e   : > { %1460 = vmatpush.bf16.msrb.mxu3 %v2624_v51  ;;  %1342 = vmatpush.bf16.msrb.mxu2 %v2613_v16 }
 0x11f   : > { %v622_v29 = vmax.f32 %v610_v20, 0.0  ;;  %v1515_v34 = vsel %vm3325_vm4, 0, %v1505_v23  ;;  %v669_v36 = vpack.c.b16 %v661_v24, %v661_v24  ;;  %v1737_v39 = vsel %vm3329_vm5, %v1732_v27, 0 }
 0x120   : > { %v1535_v41 = vunpack.c.l.b16 %v1515_v34  ;;  %v3433_v42 = vunpack.c.l.b16 %v1737_v39 }
 0x121   : > { %v640_v43 = vpack.c.bf16 %v622_v29, %v622_v29  ;;  %v702_v45 = vshrl.u32 %v669_v36, 16  ;;  %v705_v48 = vshll.u32 %v669_v36, 16  ;;  %v2621_v36 = vld [vmem:[#allocation7 + $0x140] sm:$0xff] }
 0x122   : > { %v573_v49 = vpop.f32.mrf.mxu0  ;;  %v1537_v50 = vpack.c.b16 %v1535_v41, %v3431_v40  ;;  %v1759_v53 = vpack.c.b16 %v3433_v42, %v3413_v61  ;;  %1461 = vmatpush.bf16.msrb.mxu3 %v2623_v10 }
 0x123   : > { %v3438_v56 = vunpack.c.l.b16 %v640_v43  ;;  %v595_v57 = vmul.f32 %v3302_v54, %v573_v49  ;;  %v704_v58 = vrot.slane %v702_v45, 7  ;;  %v974_v62 = vrot.slane %v705_v48, 1 }
 0x124   : > { %1602 = vmatmul.bf16.gmra.mxu0 %v1537_v50 }
 0x125   : > { %v670_v3 = vpack.c.b16 %v3438_v56, %v3438_v56  ;;  %v611_v5 = vadd.f32 %v3307_v55, %v595_v57  ;;  %v782_v6 = vpack.c.b16 %v3438_v56, %v661_v24  ;;  %v707_v7 = vor.u32 %v705_v48, %v704_v58 }
 0x126   : > { %v975_v8 = vor.u32 %v974_v62, %v702_v45  ;;  %1462 = vmatpush.bf16.msrb.mxu3 %v2622_v18 }
 0x127   : > { %v623_v11 = vmax.f32 %v611_v5, 0.0  ;;  %854 = vmatmul.bf16.gmra.mxu1 %v782_v6  ;;  %v709_v12 = vshrl.u32 %v670_v3, 16  ;;  %v712_v15 = vshll.u32 %v670_v3, 16  ;;  %v744_v60 = vsel %vm3325_vm4, 0, %v707_v7  ;;  %v2652_v6 = vld [vmem:[#allocation7 + $0x238] sm:$0xff] }
 0x128   : > { %v997_v24 = vsel %vm3329_vm5, %v975_v8, 0  ;;  %v877_v45 = vunpack.c.l.b16 %v744_v60  ;;  %v2644_v7 = vld [vmem:[#allocation7 + $0x1f8] sm:$0xff]  ;;  %1811 = vmatpush.bf16.msra.mxu2 %v2652_v6  ;;  %v2643_v60 = vld [vmem:[#allocation7 + $0x1f0] sm:$0xff] }
 0x129   : > { %v641_v19 = vpack.c.bf16 %v623_v11, %v623_v11  ;;  %v711_v20 = vrot.slane %v709_v12, 7  ;;  %v976_v23 = vrot.slane %v712_v15, 1  ;;  %v1029_v49 = vunpack.c.l.b16 %v997_v24  ;;  %1694 = vmatpush.bf16.msra.mxu1 %v2644_v7  ;;  %v2650_v7 = vld [vmem:[#allocation7 + $0x228] sm:$0xff] }
 0x12a   : > { %v575_v25 = vpop.f32.mrf.mxu0  ;;  %1463 = vmatpush.bf16.msrb.mxu3 %v2621_v36 }
 0x12b   : > { %v3449_v27 = vunpack.c.l.b16 %v641_v19  ;;  %v596_v28 = vmul.f32 %v3302_v54, %v575_v25  ;;  %v714_v29 = vor.u32 %v712_v15, %v711_v20  ;;  %v977_v34 = vor.u32 %v976_v23, %v709_v12  ;;  %v2651_v25 = vld [vmem:[#allocation7 + $0x230] sm:$0xff] }
 0x12c   : > { %1812 = vmatpush.bf16.msra.mxu2 %v2651_v25 }
 0x12d   : > { %v671_v37 = vpack.c.b16 %v3449_v27, %v3449_v27  ;;  %v612_v39 = vadd.f32 %v3307_v55, %v596_v28  ;;  %v745_v41 = vsel %vm3325_vm4, 0, %v714_v29  ;;  %v998_v43 = vsel %vm3329_vm5, %v977_v34, 0  ;;  %1695 = vmatpush.bf16.msra.mxu1 %v2643_v60 }
 0x12e   : > { %v3459_v48 = vunpack.c.l.b16 %v745_v41  ;;  %v3461_v50 = vunpack.c.l.b16 %v998_v43 }
 0x12f   : > { %v624_v51 = vmax.f32 %v612_v39, 0.0  ;;  %v716_v57 = vshrl.u32 %v671_v37, 16  ;;  %v719_v58 = vshll.u32 %v671_v37, 16 }
 0x130   : > { %v883_v62 = vpack.c.b16 %v3459_v48, %v877_v45  ;;  %v1035_v63 = vpack.c.b16 %v3461_v50, %v1029_v49  ;;  %1813 = vmatpush.bf16.msra.mxu2 %v2650_v7 }
 0x131   : > { %v642_v0 = vpack.c.bf16 %v624_v51, %v624_v51  ;;  %v718_v5 = vrot.slane %v716_v57, 7  ;;  %v978_v11 = vrot.slane %v719_v58, 1 }
 0x132   : > { %v578_v3 = vpop.f32.mrf.mxu0  ;;  %955 = vmatmul.bf16.gmra.mxu2 %v883_v62  ;;  %1107 = vmatmul.bf16.gmra.mxu3 %v1035_v63 }
 0x133   : > { %v3465_v8 = vunpack.c.l.b16 %v642_v0  ;;  %v597_v10 = vmul.f32 %v3302_v54, %v578_v3  ;;  %v721_v18 = vor.u32 %v719_v58, %v718_v5  ;;  %v979_v23 = vor.u32 %v978_v11, %v716_v57 }
 0x134   : > { %v1170_v11 = vpack.c.b16 %v3390_v30, %v3347_v44  ;;  %v2648_v44 = vld [vmem:[#allocation7 + $0x218] sm:$0xff] }
 0x135   : > { %v672_v12 = vpack.c.b16 %v3465_v8, %v3465_v8  ;;  %v3472_v15 = vpack.c.b16 %v3465_v8, %v3449_v27  ;;  %v613_v16 = vadd.f32 %v3307_v55, %v597_v10  ;;  %v746_v34 = vsel %vm3325_vm4, 0, %v721_v18  ;;  %v2642_v10 = vld [vmem:[#allocation7 + $0x1e8] sm:$0xff]  ;;  %v2649_v18 = vld [vmem:[#allocation7 + $0x220] sm:$0xff] }
 0x136   : > { %v999_v41 = vsel %vm3329_vm5, %v979_v23, 0  ;;  %v3483_v49 = vunpack.c.l.b16 %v746_v34  ;;  %1696 = vmatpush.bf16.msra.mxu1 %v2642_v10  ;;  %1814 = vmatpush.bf16.msra.mxu2 %v2649_v18 }
 0x137   : > { %859 = vmatmul.bf16.gmra.mxu1 %v3472_v15  ;;  %v723_v19 = vshrl.u32 %v672_v12, 16  ;;  %v726_v20 = vshll.u32 %v672_v12, 16  ;;  %v625_v29 = vmax.f32 %v613_v16, 0.0  ;;  %v3490_v63 = vunpack.c.l.b16 %v999_v41 }
 0x138   : > { %v1172_v10 = vpack.c.b16 %v3483_v49, %v3459_v48 }
 0x139   : > { %v725_v24 = vrot.slane %v723_v19, 7  ;;  %v980_v28 = vrot.slane %v726_v20, 1  ;;  %v643_v58 = vpack.c.bf16 %v625_v29, %v625_v29  ;;  %v1402_v59 = vpack.c.b16 %v3490_v63, %v3461_v50 }
 0x13a   : > { %v580_v36 = vpop.f32.mrf.mxu0  ;;  %1815 = vmatpush.bf16.msra.mxu2 %v2648_v44 }
 0x13b   : > { %v728_v37 = vor.u32 %v726_v20, %v725_v24  ;;  %v981_v39 = vor.u32 %v980_v28, %v723_v19  ;;  %v598_v43 = vmul.f32 %v3302_v54, %v580_v36  ;;  %v3500_v6 = vunpack.c.l.b16 %v643_v58  ;;  %v2641_v19 = vld [vmem:[#allocation7 + $0x1e0] sm:$0xff]  ;;  %v2640_v28 = vld [vmem:[#allocation7 + $0x1d8] sm:$0xff] }
 0x13c   : > { %1697 = vmatpush.bf16.msra.mxu1 %v2641_v19  ;;  %v1171_v36 = vpack.c.b16 %v3431_v40, %v3392_v31  ;;  %v2639_v31 = vld [vmem:[#allocation7 + $0x1d0] sm:$0xff] }
 0x13d   : > { %v747_v45 = vsel %vm3325_vm4, 0, %v728_v37  ;;  %v1000_v51 = vsel %vm3329_vm5, %v981_v39, 0  ;;  %v614_v57 = vadd.f32 %v3307_v55, %v598_v43  ;;  %v1131_v12 = vpack.c.b16 %v3500_v6, %v3500_v6 }
 0x13e   : > { %v3488_v62 = vunpack.c.l.b16 %v747_v45  ;;  %v3492_v0 = vunpack.c.l.b16 %v1000_v51  ;;  %v2638_v45 = vld [vmem:[#allocation7 + $0x1c8] sm:$0xff] }
 0x13f   : > { %v626_v3 = vmax.f32 %v614_v57, 0.0  ;;  %v1143_v60 = vshll.u32 %v1131_v12, 16 }
 0x140   : > { %v884_v54 = vpack.c.b16 %v3488_v62, %v3483_v49  ;;  %v3498_v5 = vpack.c.b16 %v3492_v0, %v3490_v63  ;;  %1698 = vmatpush.bf16.msra.mxu1 %v2640_v28 }
 0x141   : > { %v646_v55 = vmul.f32 %v644_v22, %v626_v3  ;;  %v1140_v22 = vshrl.u32 %v1131_v12, 16  ;;  %v1374_v35 = vrot.slane %v1143_v60, 1 }
 0x142   : > { %960 = vmatmul.bf16.gmra.mxu2 %v884_v54  ;;  %1112 = vmatmul.bf16.gmra.mxu3 %v3498_v5 }
 0x143   : > { %1607 = vmatmul.bf16.gmra.mxu0 %v884_v54  ;;  %v648_v16 = vpack.c.bf16 %v646_v55, %v646_v55  ;;  %v1142_v25 = vrot.slane %v1140_v22, 7  ;;  %v1375_v39 = vor.u32 %v1374_v35, %v1140_v22  ;;  %v2646_v54 = vld [vmem:[#allocation7 + $0x208] sm:$0xff]  ;;  %v2637_v55 = vld [vmem:[#allocation7 + $0x1c0] sm:$0xff] }
 0x144   : > { %1699 = vmatpush.bf16.msra.mxu1 %v2639_v31 }
 0x145   : > { %v3509_v20 = vunpack.c.l.b16 %v648_v16  ;;  %v1145_v30 = vor.u32 %v1143_v60, %v1142_v25  ;;  %v1379_v51 = vsel %vm3329_vm5, %v1375_v39, 0 }
 0x146   : > { %v1399_v58 = vunpack.c.l.b16 %v1379_v51 }
 0x147   : > { %1234 = vmatmul.bf16.vlgmr.msrb.gmra.mxu1 %v1170_v11  ;;  %v1498_v23 = vpack.c.b16 %v3509_v20, %v3509_v20  ;;  %v1149_v37 = vsel %vm3325_vm4, 0, %v1145_v30  ;;  %v1643_v41 = vpack.c.b16 %v3509_v20, %v3500_v6  ;;  %v1281_v11 = vpack.c.b16 %v3449_v27, %v3438_v56  ;;  %v2659_v20 = vld [vmem:[#allocation8 + $0x30] sm:$0xff] }
 0x148   : > { %v1169_v9 = vunpack.c.l.b16 %v1149_v37  ;;  %1700 = vmatpush.bf16.msra.mxu1 %v2638_v45  ;;  %v1403_v48 = vpack.c.b16 %v1399_v58, %v3492_v0 }
 0x149   : > { %v1507_v24 = vshrl.u32 %v1498_v23, 16  ;;  %v1510_v34 = vshll.u32 %v1498_v23, 16 }
 0x14a   : > { %v1173_v32 = vpack.c.b16 %v1169_v9, %v3488_v62 }
 0x14b   : > { %v1509_v29 = vrot.slane %v1507_v24, 7  ;;  %v1733_v40 = vrot.slane %v1510_v34, 1 }
 0x14c   : > { %1701 = vmatpush.bf16.msra.mxu1 %v2637_v55  ;;  %v2655_v55 = vld [vmem:[#allocation8 + $0x10] sm:$0xff] }
 0x14d   : > { %v1512_v13 = vor.u32 %v1510_v34, %v1509_v29  ;;  %v1734_v57 = vor.u32 %v1733_v40, %v1507_v24  ;;  %v2657_v40 = vld [vmem:[#allocation8 + $0x20] sm:$0xff] }
 0x14f   : > { %v1516_v46 = vsel %vm3325_vm4, 0, %v1512_v13  ;;  %v1738_v21 = vsel %vm3329_vm5, %v1734_v57, 0  ;;  %v2660_v13 = vld [vmem:[#allocation8 + $0x38] sm:$0xff] }
 0x150   : > { %v1758_v3 = vunpack.c.l.b16 %v1738_v21  ;;  %1948 = vmatpush.bf16.msra.mxu3 %v2660_v13 }
 0x152   : > { %1343 = vmatmul.bf16.vlgmr.msrb.gmra.mxu2 %v1279_v47  ;;  %1464 = vmatmul.bf16.vlgmr.msrb.gmra.mxu3 %v1400_v14  ;;  %v2647_v47 = vld [vmem:[#allocation7 + $0x210] sm:$0xff]  ;;  %v1536_v14 = vunpack.c.l.b16 %v1516_v46  ;;  %v1760_v7 = vpack.c.b16 %v1758_v3, %v1399_v58  ;;  %v2656_v58 = vld [vmem:[#allocation8 + $0x18] sm:$0xff] }
 0x153   : > { %1816 = vmatpush.bf16.msra.mxu2 %v2647_v47 }
 0x154   : > { %v1538_v43 = vpack.c.b16 %v1536_v14, %v1169_v9  ;;  %1949 = vmatpush.bf16.msra.mxu3 %v2659_v20 }
 0x156   : > { %1612 = vmatmul.bf16.gmra.mxu0 %v1538_v43 }
 0x157   : > { %1239 = vmatmul.bf16.gmra.mxu1 %v1171_v36  ;;  %1817 = vmatpush.bf16.msra.mxu2 %v2646_v54 }
 0x15b   : > { %1818 = vmatpush.bf16.msra.mxu2 %v2645_v26 }
 0x162   : > { %1348 = vmatmul.bf16.gmra.mxu2 %v1280_v33  ;;  %1469 = vmatmul.bf16.gmra.mxu3 %v1401_v4  ;;  %v1282_v4 = vpack.c.b16 %v3500_v6, %v3465_v8 }
 0x167   : > { %1244 = vmatmul.bf16.gmra.mxu1 %v1172_v10 }
 0x172   : > { %1353 = vmatmul.bf16.gmra.mxu2 %v1281_v11  ;;  %1474 = vmatmul.bf16.gmra.mxu3 %v1402_v59 }
 0x174   : > { %v845_v33 = vpop.f32.mrf.mxu1 }
 0x177   : > { %1249 = vmatmul.bf16.gmra.mxu1 %v1173_v32 }
 0x17c   : > { %v847_v56 = vpop.f32.mrf.mxu1 }
 0x182   : > { %1358 = vmatmul.bf16.gmra.mxu2 %v1282_v4  ;;  %1479 = vmatmul.bf16.gmra.mxu3 %v1403_v48 }
 0x184   : > { %v850_v18 = vpop.f32.mrf.mxu1 }
 0x185   : > { %v946_v49 = vpop.f32.mrf.mxu2  ;;  %v1098_v12 = vpop.f32.mrf.mxu3 }
 0x186   : > { %v947_v16 = vadd.f32 %v946_v49, %v845_v33  ;;  %v2654_v33 = vld [vmem:[#allocation8 + $0x8] sm:$0xff] }
 0x187   : > { %1702 = vmatmul.bf16.vlgmr.msra.gmra.mxu1 %v3364_v1 }
 0x188   : > { %v1118_v27 = vadd.f32 %v1098_v12, %v947_v16  ;;  %v2653_v12 = vld [vmem:[#allocation8] sm:$0xff] }
 0x18c   : > { %v852_v23 = vpop.f32.mrf.mxu1 }
 0x18d   : > { %v948_v50 = vpop.f32.mrf.mxu2  ;;  %v3548_v63 = vpop.f32.mrf.mxu3 }
 0x18e   : > { %v3550_v62 = vadd.f32 %v948_v50, %v847_v56 }
 0x192   : > { %1819 = vmatmul.bf16.vlgmr.msra.gmra.mxu2 %v3402_v38 }
 0x195   : > { %v951_v8 = vpop.f32.mrf.mxu2  ;;  %v1103_v0 = vpop.f32.mrf.mxu3 }
 0x196   : > { %v952_v19 = vadd.f32 %v951_v8, %v850_v18 }
 0x197   : > { %1707 = vmatmul.bf16.gmra.mxu1 %v1642_v2 }
 0x198   : > { %v1120_v22 = vadd.f32 %v1103_v0, %v952_v19  ;;  %v1119_v19 = vadd.f32 %v3548_v63, %v3550_v62  ;;  %v3599_v62 = vld [vmem:[%s3763_s1] ss:$0 sm:$0xff] }
 0x19d   : > { %v953_v1 = vpop.f32.mrf.mxu2  ;;  %v3562_v44 = vpop.f32.mrf.mxu3 }
 0x19e   : > { %v3556_v25 = vadd.f32 %v953_v1, %v852_v23 }
 0x1a2   : > { %1824 = vmatmul.bf16.gmra.mxu2 %v1759_v53 }
 0x1a4   : > { %v855_v60 = vpop.f32.mrf.mxu1 }
 0x1a7   : > { %1712 = vmatmul.bf16.gmra.mxu1 %v3472_v15 }
 0x1ac   : > { %v857_v38 = vpop.f32.mrf.mxu1 }
 0x1b2   : > { %1829 = vmatmul.bf16.gmra.mxu2 %v3498_v5 }
 0x1b4   : > { %v860_v30 = vpop.f32.mrf.mxu1 }
 0x1b5   : > { %v956_v17 = vpop.f32.mrf.mxu2  ;;  %v1108_v52 = vpop.f32.mrf.mxu3 }
 0x1b6   : > { %v957_v2 = vadd.f32 %v956_v17, %v855_v60 }
 0x1b7   : > { %1717 = vmatmul.bf16.gmra.mxu1 %v1643_v41  ;;  %v2658_v41 = vld [vmem:[#allocation8 + $0x28] sm:$0xff] }
 0x1b8   : > { %v1122_v24 = vadd.f32 %v1108_v52, %v957_v2  ;;  %1950 = vmatpush.bf16.msra.mxu3 %v2658_v41 }
 0x1bc   : > { %v862_v28 = vpop.f32.mrf.mxu1  ;;  %1951 = vmatpush.bf16.msra.mxu3 %v2657_v40 }
 0x1bd   : > { %v958_v61 = vpop.f32.mrf.mxu2  ;;  %v3568_v42 = vpop.f32.mrf.mxu3 }
 0x1be   : > { %v3570_v53 = vadd.f32 %v958_v61, %v857_v38 }
 0x1c0   : > { %1952 = vmatpush.bf16.msra.mxu3 %v2656_v58 }
 0x1c2   : > { %1834 = vmatmul.bf16.gmra.mxu2 %v1760_v7 }
 0x1c4   : > { %v1235_v15 = vpop.f32.mrf.mxu1  ;;  %1953 = vmatpush.bf16.msra.mxu3 %v2655_v55 }
 0x1c5   : > { %v1255_v29 = vadd.f32 %v1235_v15, %v1118_v27  ;;  %v961_v34 = vpop.f32.mrf.mxu2  ;;  %v1113_v36 = vpop.f32.mrf.mxu3 }
 0x1c6   : > { %v962_v5 = vadd.f32 %v961_v34, %v860_v30  ;;  %v1598_v27 = vpop.f32.mrf.mxu0 }
 0x1c8   : > { %v1124_v37 = vadd.f32 %v1113_v36, %v962_v5  ;;  %1954 = vmatpush.bf16.msra.mxu3 %v2654_v33  ;;  %v1121_v36 = vadd.f32 %v3562_v44, %v3556_v25 }
 0x1cc   : > { %v1237_v35 = vpop.f32.mrf.mxu1  ;;  %1955 = vmatpush.bf16.msra.mxu3 %v2653_v12 }
 0x1cd   : > { %v963_v47 = vpop.f32.mrf.mxu2  ;;  %v3576_v10 = vpop.f32.mrf.mxu3  ;;  %v1256_v0 = vadd.f32 %v1237_v35, %v1119_v19 }
 0x1ce   : > { %v3572_v6 = vadd.f32 %v963_v47, %v862_v28  ;;  %v1600_v1 = vpop.f32.mrf.mxu0  ;;  %v3593_v28 = vld [vmem:[%s3719_s5] ss:$0 sm:$0xff] }
 0x1d4   : > { %v1240_v46 = vpop.f32.mrf.mxu1 }
 0x1d5   : > { %v1257_v9 = vadd.f32 %v1240_v46, %v1120_v22  ;;  %v1344_v14 = vpop.f32.mrf.mxu2  ;;  %v1465_v48 = vpop.f32.mrf.mxu3 }
 0x1d6   : > { %v1364_v39 = vadd.f32 %v1344_v14, %v1255_v29  ;;  %v1603_v15 = vpop.f32.mrf.mxu0 }
 0x1d8   : > { %v1485_v22 = vadd.f32 %v1465_v48, %v1364_v39 }
 0x1da   : > { %v1618_v38 = vadd.f32 %v1598_v27, %v1485_v22 }
 0x1dc   : > { %v1242_v43 = vpop.f32.mrf.mxu1 }
 0x1dd   : > { %v1346_v31 = vpop.f32.mrf.mxu2  ;;  %v1467_v50 = vpop.f32.mrf.mxu3  ;;  %v1258_v13 = vadd.f32 %v1242_v43, %v1121_v36 }
 0x1de   : > { %v1365_v23 = vadd.f32 %v1346_v31, %v1256_v0  ;;  %v1605_v40 = vpop.f32.mrf.mxu0 }
 0x1e0   : > { %v1486_v17 = vadd.f32 %v1467_v50, %v1365_v23 }
 0x1e2   : > { %v1619_v61 = vadd.f32 %v1600_v1, %v1486_v17 }
 0x1e4   : > { %v1245_v45 = vpop.f32.mrf.mxu1 }
 0x1e5   : > { %v1259_v51 = vadd.f32 %v1245_v45, %v1122_v24  ;;  %v1349_v57 = vpop.f32.mrf.mxu2  ;;  %v1470_v60 = vpop.f32.mrf.mxu3 }
 0x1e6   : > { %v1366_v21 = vadd.f32 %v1349_v57, %v1257_v9 }
 0x1e8   : > { %v1487_v35 = vadd.f32 %v1470_v60, %v1366_v21 }
 0x1ea   : > { %v1620_v39 = vadd.f32 %v1603_v15, %v1487_v35 }
 0x1ec   : > { %v3574_v3 = vpop.f32.mrf.mxu1 }
 0x1ed   : > { %v1351_v54 = vpop.f32.mrf.mxu2  ;;  %v1472_v34 = vpop.f32.mrf.mxu3 }
 0x1ee   : > { %v1367_v9 = vadd.f32 %v1351_v54, %v1258_v13  ;;  %v1608_v54 = vpop.f32.mrf.mxu0 }
 0x1f4   : > { %v1250_v7 = vpop.f32.mrf.mxu1 }
 0x1f5   : > { %v1261_v26 = vadd.f32 %v1250_v7, %v1124_v37  ;;  %v1354_v11 = vpop.f32.mrf.mxu2  ;;  %v1475_v25 = vpop.f32.mrf.mxu3 }
 0x1f6   : > { %v3578_v59 = vadd.f32 %v1354_v11, %v1259_v51  ;;  %v1488_v51 = vadd.f32 %v1472_v34, %v1367_v9  ;;  %v1123_v11 = vadd.f32 %v3568_v42, %v3570_v53  ;;  %v1610_v60 = vpop.f32.mrf.mxu0 }
 0x1f8   : > { %v1621_v43 = vadd.f32 %v1605_v40, %v1488_v51  ;;  %v1260_v48 = vadd.f32 %v3574_v3, %v1123_v11 }
 0x1fc   : > { %v3580_v32 = vpop.f32.mrf.mxu1 }
 0x1fd   : > { %v3582_v4 = vpop.f32.mrf.mxu2  ;;  %v1477_v27 = vpop.f32.mrf.mxu3 }
 0x1fe   : > { %v1369_v50 = vadd.f32 %v3582_v4, %v1260_v48 }
 0x200   : > { %v1490_v53 = vadd.f32 %v1477_v27, %v1369_v50 }
 0x204   : > { %v1703_v49 = vpop.f32.mrf.mxu1 }
 0x205   : > { %v1359_v16 = vpop.f32.mrf.mxu2  ;;  %v1723_v52 = vadd.f32 %v1703_v49, %v1618_v38  ;;  %v1489_v49 = vadd.f32 %v1475_v25, %v3578_v59  ;;  %v1623_v38 = vadd.f32 %v1610_v60, %v1490_v53 }
 0x206   : > { %v3584_v56 = vadd.f32 %v1359_v16, %v1261_v26 }
 0x207   : > { %v1622_v19 = vadd.f32 %v1608_v54, %v1489_v49  ;;  %v2819_v49 = vld [vmem:[%s3285_s26 + $0x8] sm:$0xff] }
 0x20c   : > { %v1705_v18 = vpop.f32.mrf.mxu1 }
 0x20d   : > { %v3586_v8 = vpop.f32.mrf.mxu2  ;;  %v1724_v29 = vadd.f32 %v1705_v18, %v1619_v61  ;;  %v1613_v61 = vpop.f32.mrf.mxu0 }
 0x214   : > { %v1708_v2 = vpop.f32.mrf.mxu1 }
 0x215   : > { %v1820_v30 = vpop.f32.mrf.mxu2  ;;  %v1725_v57 = vadd.f32 %v1708_v2, %v1620_v39  ;;  %v1125_v2 = vadd.f32 %v3576_v10, %v3572_v6 }
 0x216   : > { %v1840_v24 = vadd.f32 %v1820_v30, %v1723_v52  ;;  %v1480_v30 = vpop.f32.mrf.mxu3 }
 0x218   : > { %v1852_v63 = vmul.f32 %v3593_v28, %v1840_v24 }
 0x21a   : > { %v1864_v47 = vadd.f32 %v3599_v62, %v1852_v63  ;;  %v1491_v63 = vadd.f32 %v1480_v30, %v3584_v56 }
 0x21c   : > { %v1710_v46 = vpop.f32.mrf.mxu1  ;;  %v1872_v41 = vmax.f32 %v1864_v47, 0.0  ;;  %v1624_v13 = vadd.f32 %v1613_v61, %v1491_v63 }
 0x21d   : > { %v1822_v5 = vpop.f32.mrf.mxu2  ;;  %v1726_v55 = vadd.f32 %v1710_v46, %v1621_v43  ;;  %v2816_v43 = vld [vmem:[%s3765_s30] ss:$0 sm:$0xff] }
 0x21e   : > { %v1841_v37 = vadd.f32 %v1822_v5, %v1724_v29  ;;  %v1262_v29 = vadd.f32 %v3580_v32, %v1125_v2  ;;  %v1615_v32 = vpop.f32.mrf.mxu0 }
 0x220   : > { %v1853_v20 = vmul.f32 %v3593_v28, %v1841_v37  ;;  %v1371_v36 = vadd.f32 %v3586_v8, %v1262_v29 }
 0x222   : > { %v1865_v14 = vadd.f32 %v3599_v62, %v1853_v20  ;;  %v1482_v20 = vpop.f32.mrf.mxu3 }
 0x223   : > { %v1492_v10 = vadd.f32 %v1482_v20, %v1371_v36 }
 0x224   : > { %v1873_v31 = vmax.f32 %v1865_v14, 0.0  ;;  %v1713_v21 = vpop.f32.mrf.mxu1 }
 0x225   : > { %v1825_v45 = vpop.f32.mrf.mxu2  ;;  %v1727_v1 = vadd.f32 %v1713_v21, %v1622_v19  ;;  %v1625_v39 = vadd.f32 %v1615_v32, %v1492_v10  ;;  %v2817_v21 = vld [vmem:[%s3766_s9] ss:$0 sm:$0xff]  ;;  %v2820_v19 = vld [vmem:[%s3285_s26 + $0x10] sm:$0xff]  ;;  %v2825_v10 = vld [vmem:[%s3285_s26 + $0x58] sm:$0xff] }
 0x226   : > { %v1880_v58 = vpack.c.bf16 %v1873_v31, %v1872_v41  ;;  %v1842_v44 = vadd.f32 %v1825_v45, %v1725_v57 }
 0x228   : > { %1956 = vmatmul.bf16.vlgmr.msra.gmra.mxu3 %v1880_v58  ;;  %v1854_v7 = vmul.f32 %v3593_v28, %v1842_v44 }
 0x22a   : > { %v1866_v16 = vadd.f32 %v3599_v62, %v1854_v7 }
 0x22c   : > { %v1874_v0 = vmax.f32 %v1866_v16, 0.0  ;;  %v1715_v23 = vpop.f32.mrf.mxu1 }
 0x22d   : > { %v1827_v26 = vpop.f32.mrf.mxu2  ;;  %v1728_v17 = vadd.f32 %v1715_v23, %v1623_v38 }
 0x22e   : > { %v1843_v33 = vadd.f32 %v1827_v26, %v1726_v55 }
 0x230   : > { %v1855_v12 = vmul.f32 %v3593_v28, %v1843_v33 }
 0x232   : > { %v1867_v18 = vadd.f32 %v3599_v62, %v1855_v12 }
 0x234   : > { %v1875_v22 = vmax.f32 %v1867_v18, 0.0  ;;  %v1718_v15 = vpop.f32.mrf.mxu1 }
 0x235   : > { %v1830_v42 = vpop.f32.mrf.mxu2  ;;  %v1729_v46 = vadd.f32 %v1718_v15, %v1624_v13  ;;  %v2823_v15 = vld [vmem:[%s3285_s26 + $0x48] sm:$0xff] }
 0x236   : > { %v1881_v3 = vpack.c.bf16 %v1875_v22, %v1874_v0  ;;  %v1844_v59 = vadd.f32 %v1830_v42, %v1727_v1  ;;  %v2821_v1 = vld [vmem:[%s3285_s26 + $0x18] sm:$0xff] }
 0x238   : > { %1961 = vmatmul.bf16.gmra.mxu3 %v1881_v3  ;;  %v1856_v52 = vmul.f32 %v3593_v28, %v1844_v59 }
 0x23a   : > { %v1868_v5 = vadd.f32 %v3599_v62, %v1856_v52 }
 0x23c   : > { %v1876_v35 = vmax.f32 %v1868_v5, 0.0  ;;  %v1720_v56 = vpop.f32.mrf.mxu1 }
 0x23d   : > { %v1832_v4 = vpop.f32.mrf.mxu2  ;;  %v1730_v41 = vadd.f32 %v1720_v56, %v1625_v39 }
 0x23e   : > { %v1845_v24 = vadd.f32 %v1832_v4, %v1728_v17  ;;  %v2822_v17 = vld [vmem:[%s3285_s26 + $0x40] sm:$0xff] }
 0x240   : > { %v1857_v34 = vmul.f32 %v3593_v28, %v1845_v24 }
 0x242   : > { %v1869_v37 = vadd.f32 %v3599_v62, %v1857_v34 }
 0x244   : > { %v1877_v47 = vmax.f32 %v1869_v37, 0.0  ;;  %v2824_v37 = vld [vmem:[%s3285_s26 + $0x50] sm:$0xff] }
 0x245   : > { %v1835_v6 = vpop.f32.mrf.mxu2 }
 0x246   : > { %v1882_v9 = vpack.c.bf16 %v1877_v47, %v1876_v35  ;;  %v1846_v14 = vadd.f32 %v1835_v6, %v1729_v46 }
 0x248   : > { %1966 = vmatmul.bf16.gmra.mxu3 %v1882_v9  ;;  %v1858_v31 = vmul.f32 %v3593_v28, %v1846_v14 }
 0x24a   : > { %v1870_v51 = vadd.f32 %v3599_v62, %v1858_v31 }
 0x24c   : > { %v1878_v58 = vmax.f32 %v1870_v51, 0.0 }
 0x24d   : > { %v1837_v8 = vpop.f32.mrf.mxu2 }
 0x24e   : > { %v1847_v40 = vadd.f32 %v1837_v8, %v1730_v41 }
 0x250   : > { %v1859_v45 = vmul.f32 %v3593_v28, %v1847_v40 }
 0x252   : > { %v1871_v57 = vadd.f32 %v3599_v62, %v1859_v45  ;;  %v2818_v62 = vld [vmem:[%s3285_s26] sm:$0xff] }
 0x254   : > { %v1879_v25 = vmax.f32 %v1871_v57, 0.0 }
 0x256   : > { %v1883_v44 = vpack.c.bf16 %v1879_v25, %v1878_v58 }
 0x258   : > { %1971 = vmatmul.bf16.gmra.mxu3 %v1883_v44 }
 0x2ab   : > { %v1957_v55 = vpop.f32.mrf.mxu3 }
 0x2ac   : > { %v1981_v7 = vmul.f32 %v2816_v43, %v1957_v55 }
 0x2ae   : > { %v1993_v28 = vadd.f32 %v2817_v21, %v1981_v7 }
 0x2b0   : > { %v2001_v54 = vadd.f32 %v2818_v62, %v1993_v28 }
 0x2b2   : > { %v2009_v26 = vmax.f32 %v2001_v54, 0.0 }
 0x2b3   : > { %v1959_v11 = vpop.f32.mrf.mxu3 }
 0x2b4   : > { %2017 = vst [vmem:[%s3638_s12] sm:$0xff] %v2009_v26  ;;  %v1982_v33 = vmul.f32 %v2816_v43, %v1959_v11 }
 0x2b6   : > { %v1994_v48 = vadd.f32 %v2817_v21, %v1982_v33 }
 0x2b8   : > { %v2002_v12 = vadd.f32 %v2819_v49, %v1994_v48 }
 0x2ba   : > { %v2010_v16 = vmax.f32 %v2002_v12, 0.0 }
 0x2bb   : > { %v1962_v27 = vpop.f32.mrf.mxu3 }
 0x2bc   : > { %2018 = vst [vmem:[%s3638_s12 + $0x8] sm:$0xff] %v2010_v16  ;;  %v1983_v50 = vmul.f32 %v2816_v43, %v1962_v27 }
 0x2be   : > { %v1995_v18 = vadd.f32 %v2817_v21, %v1983_v50 }
 0x2c0   : > { %v2003_v0 = vadd.f32 %v2820_v19, %v1995_v18 }
 0x2c2   : > { %v2011_v22 = vmax.f32 %v2003_v0, 0.0 }
 0x2c3   : > { %v1964_v23 = vpop.f32.mrf.mxu3 }
 0x2c4   : > { %2019 = vst [vmem:[%s3638_s12 + $0x10] sm:$0xff] %v2011_v22  ;;  %v1984_v42 = vmul.f32 %v2816_v43, %v1964_v23 }
 0x2c6   : > { %v1996_v53 = vadd.f32 %v2817_v21, %v1984_v42 }
 0x2c8   : > { %v2004_v3 = vadd.f32 %v2821_v1, %v1996_v53 }
 0x2ca   : > { %v2012_v60 = vmax.f32 %v2004_v3, 0.0 }
 0x2cb   : > { %v1967_v59 = vpop.f32.mrf.mxu3 }
 0x2cc   : > { %2020 = vst [vmem:[%s3638_s12 + $0x18] sm:$0xff] %v2012_v60  ;;  %v1985_v38 = vmul.f32 %v2816_v43, %v1967_v59 }
 0x2ce   : > { %v1997_v30 = vadd.f32 %v2817_v21, %v1985_v38 }
 0x2d0   : > { %v2005_v52 = vadd.f32 %v2822_v17, %v1997_v30 }
 0x2d2   : > { %v2013_v4 = vmax.f32 %v2005_v52, 0.0 }
 0x2d3   : > { %v1969_v2 = vpop.f32.mrf.mxu3 }
 0x2d4   : > { %2021 = vst [vmem:[%s3638_s12 + $0x20] sm:$0xff] %v2013_v4  ;;  %v1986_v24 = vmul.f32 %v2816_v43, %v1969_v2 }
 0x2d6   : > { %v1998_v61 = vadd.f32 %v2817_v21, %v1986_v24 }
 0x2d8   : > { %v2006_v29 = vadd.f32 %v2823_v15, %v1998_v61 }
 0x2da   : > { %v2014_v63 = vmax.f32 %v2006_v29, 0.0 }
 0x2db   : > { %v1972_v34 = vpop.f32.mrf.mxu3 }
 0x2dc   : > { %2022 = vst [vmem:[%s3638_s12 + $0x28] sm:$0xff] %v2014_v63  ;;  %v1987_v5 = vmul.f32 %v2816_v43, %v1972_v34 }
 0x2de   : > { %v1999_v36 = vadd.f32 %v2817_v21, %v1987_v5 }
 0x2e0   : > { %v2007_v13 = vadd.f32 %v2824_v37, %v1999_v36 }
 0x2e2   : > { %v2015_v35 = vmax.f32 %v2007_v13, 0.0 }
 0x2e3   : > { %v1974_v47 = vpop.f32.mrf.mxu3 }
 0x2e4   : > { %2023 = vst [vmem:[%s3638_s12 + $0x30] sm:$0xff] %v2015_v35  ;;  %v1988_v20 = vmul.f32 %v2816_v43, %v1974_v47 }
 0x2e6   : > { %v2000_v6 = vadd.f32 %v2817_v21, %v1988_v20 }
 0x2e8   : > { %v2008_v46 = vadd.f32 %v2825_v10, %v2000_v6 }
 0x2ea   : > { %v2016_v9 = vmax.f32 %v2008_v46, 0.0 }
 0x2ec   : > { %2024 = vst [vmem:[%s3638_s12 + $0x38] sm:$0xff] %v2016_v9 }
 0x2ed   : > { %s3767_s13 = sld [smem:[#allocation19_spill]]  ;;  %s2051_s25 = sshll.u32 %s3638_s12, 4  ;;  %s2052_s25 = int_to_ptr.vmem [resolvable:$true] %s2051_s25 }
 0x2ee   : > { %s3769_s21 = sld [smem:[#allocation31_spill]]  ;;  %s3057_s8 = smov 512  }
 0x2ef   : > { %2676 = sst [smem:[#allocation12]] (%p3189_p6), %s3057_s8  ;;  %s3058_s30 = smov 1024  }
 0x2f0   : > { %2677 = sst [smem:[#allocation12 + $0x1]] (%p3189_p6), %s3058_s30  ;;  %s3059_s28 = smov 4  }
 0x2f1   : > { %2678 = sst [smem:[#allocation12 + $0x2]] (%p3189_p6), %s3059_s28  ;;  %s3061_s4 = smov 8  }
 0x2f2   : > { %2681 = sst [smem:[#allocation12 + $0x5]] (%p3189_p6), %s3061_s4  ;;  %s3062_s9 = smov [#allocation11]  }
 0x2f3   : > { %s2661_s19 = sshll.u32 %s3767_s13, 4  ;;  %s3063_s20 = smov 0  }
 0x2f4   : > { %s2038_s7 = sadd.s32 %s2661_s19, %s3280_s6  ;;  %s3060_s6 = smov 128  }
 0x2f5   : > { %s2567_s16 = sshll.u32 %s2038_s7, 3  ;;  %2679 = sst [smem:[#allocation12 + $0x3]] (%p3189_p6), %s3060_s6 }
 0x2f6   : > { %s2040_s27 = scalar_lea.hbm %s3769_s21, %s2567_s16  ;;  %2680 = sst [smem:[#allocation12 + $0x4]] (%p3189_p6), %s3060_s6 }
 0x2f7   : > { %s2053_s14 = sshll.u32 %s2040_s27, 4  ;;  %s2054_s14 = int_to_ptr.hbm [resolvable:$true] %s2053_s14 }
 0x2f8   : > { %2682 = dma.general (%p3189_p6), %s2052_s25, 1024, %s2054_s14, %s2026_s24, %s3062_s9, [#allocation12], %s3063_s20, 0  }
 0x2f9 PF: > { %s3770_s12 = sld [smem:[#allocation17_spill]]  ;;  %p2709_p2 = scmp.ge.s32.totalorder %s3048_s23, 2 }
 0x2fb   : > { %p2699_p3 = pnand %p2709_p2, %p3195_p10 }
 0x2fd   : > { %p2700_p5 = pneg %p2699_p3 }
 0x2ff   : > { %s2081_s19 = sand.u32 1, %s3770_s12  }
 0x300   : > { %s2082_s7 = scalar_lea.sflag [#allocation4], %s2081_s19 }
 0x301   : > { %3003 = dma.done.wait (%p2700_p5), %s2082_s7, 1024  }
 0x302   : > { %3005 = vsyncadd (%p2700_p5), %s2082_s7, 4294966272  ;;  %s28_s23 = sadd.s32 1, %s3048_s23   ;;  %s3772_s13 = sld [smem:[#allocation18_spill]] }
 0x303   : > { %p25_p7 = scmp.ge.s32.totalorder %s28_s23, 6   ;;  %s3773_s19 = sld [smem:[#allocation20_spill]] }
 0x304   : > { %s3774_s21 = sld [smem:[#allocation23_spill]]  ;;  %s3776_s14 = smov %s3016_s15 }
 0x305   : > { %s3775_s24 = sld [smem:[#allocation24_spill]]  ;;  %s3777_s15 = smov %s3253_s29 }
 0x306   : > { %s3778_s16 = smov %s3024_s17  ;;  %s3779_s17 = smov %s3028_s18 }
 0x307   : > { %s3780_s18 = smov %s3250_s10  ;;  %s3781_s20 = smov %s3044_s22 }
 0x308   :  { %27 = sbr.rel (!%p25_p7) target bundleno = 19 (0x13), region = 125 }
 0x30b   : > { %s3782_s22 = smov %s3775_s24 }
 0x30d   :  { %2088 = vsyncpa [#allocation3], 1 }
 0x30e   :  { %2090 = vsyncpa [#allocation3 + $0x1], 1 }
 0x30f   :  { %2091 = vsyncpa [#allocation6], 1 }
 0x310   :  { %2092 = vsyncpa [#allocation9], 1 }
 0x311   :  { %2093 = vsyncpa [#allocation4], 1 }
 0x312   :  { %2095 = vsyncpa [#allocation4 + $0x1], 1 }

</bundles_post_ra>
